<compile_context>
chip_gen: v7x
topology: tpu7x:2x2x1
jax: 0.10.0
libtpu: 0.0.40
codegen_flags: <defaults>
</compile_context>

<pallas_src>
import functools
import math

import jax
import jax.numpy as jnp
from jax.experimental import pallas as pl
from jax.experimental.pallas import tpu as pltpu

LN_EPS = 1e-5
MASK_NEG = -1e30  # finite large-negative instead of -inf (no NaN for all-masked rows)


def _layernorm(v, g, b):
    mu = jnp.mean(v, axis=-1, keepdims=True)
    var = jnp.mean((v - mu) ** 2, axis=-1, keepdims=True)
    return (v - mu) * jax.lax.rsqrt(var + LN_EPS) * g + b


# ---------------------------------------------------------------------------
# Fused kernel: per batch element -> full EncoderLayer forward.
# ---------------------------------------------------------------------------
def encoder_layer_kernel(x_ref, mask_ref, npm_ref,
                         wqkv_ref, bqkv_ref, wfc_ref, bfc_ref,
                         ln1g_ref, ln1b_ref,
                         w1_ref, b1_ref, w2_ref, b2_ref,
                         ln2g_ref, ln2b_ref,
                         o_ref, attn_ref,
                         *, n_head, d_k, d_v, scale):
    x = x_ref[0]                                           # (S, D) f32
    npm = npm_ref[0]                                       # (S, 1) f32

    # Additive key-pad bias, computed ONCE per batch step and reused by every head.
    neg_bias = jnp.where(mask_ref[0] > 0, MASK_NEG, 0.0)   # (S, S) f32

    # Fused QKV projection for all heads: one lane-dense MXU matmul
    # (bf16 inputs, f32 accumulation).
    qkv = jnp.dot(x.astype(jnp.bfloat16), wqkv_ref[...],
                  preferred_element_type=jnp.float32) + bqkv_ref[...]   # (S, H*(2dk+dv))
    nq = n_head * d_k

    ctx = []
    for h in range(n_head):                                # static unroll, H small
        q = qkv[:, h * d_k:(h + 1) * d_k] * scale          # fold 1/sqrt(d_k) into q
        k = qkv[:, nq + h * d_k: nq + (h + 1) * d_k]
        v = qkv[:, 2 * nq + h * d_v: 2 * nq + (h + 1) * d_v]

        s = jnp.dot(q.astype(jnp.bfloat16), k.astype(jnp.bfloat16).T,
                    preferred_element_type=jnp.float32) + neg_bias      # (S, S) f32
        m = jnp.max(s, axis=-1, keepdims=True)
        e = jnp.exp(s - m)
        p = e * pl.reciprocal(jnp.sum(e, axis=-1, keepdims=True), approx=True)

        attn_ref[h, 0] = p                                  # (S, S)
        ctx.append(jnp.dot(p.astype(jnp.bfloat16), v.astype(jnp.bfloat16),
                           preferred_element_type=jnp.float32))          # (S, d_v)

    # Heads concatenated directly in VMEM (no HBM bounce, no host transpose).
    concat = jnp.concatenate(ctx, axis=-1)                  # (S, H*dv)

    # Output projection + residual + LayerNorm + non_pad_mask.
    y = jnp.dot(concat.astype(jnp.bfloat16), wfc_ref[...],
                preferred_element_type=jnp.float32) + bfc_ref[...] + x
    y = _layernorm(y, ln1g_ref[...], ln1b_ref[...]) * npm

    # Position-wise FFN + residual + LayerNorm + non_pad_mask.
    h1 = jnp.dot(y.astype(jnp.bfloat16), w1_ref[...],
                 preferred_element_type=jnp.float32) + b1_ref[...]
    h1 = jnp.maximum(h1, 0.0)
    z = jnp.dot(h1.astype(jnp.bfloat16), w2_ref[...],
                preferred_element_type=jnp.float32) + b2_ref[...] + y
    out = _layernorm(z, ln2g_ref[...], ln2b_ref[...]) * npm
    o_ref[0] = out


# ---------------------------------------------------------------------------
# Wrapper: EncoderLayer forward.
# ---------------------------------------------------------------------------
def encoder_layer_forward(x, params, non_pad_mask, slf_attn_mask):
    B, S, D = x.shape
    H, dk, dv = params["n_head"], params["d_k"], params["d_v"]
    d_inner = params["W1"].shape[1]
    scale = 1.0 / math.sqrt(dk)
    nqkv = H * (2 * dk + dv)

    # One-time weight packing (would be pre-fused offline in a real deployment):
    # stack the per-head q/k/v projections into a single lane-dense matrix,
    # and store all MXU weights in bf16 (halves HBM/VMEM footprint).
    wq = jnp.transpose(params["Wq"], (1, 0, 2)).reshape(D, H * dk)
    wk = jnp.transpose(params["Wk"], (1, 0, 2)).reshape(D, H * dk)
    wv = jnp.transpose(params["Wv"], (1, 0, 2)).reshape(D, H * dv)
    w_qkv = jnp.concatenate([wq, wk, wv], axis=1).astype(jnp.bfloat16)   # (D, nqkv)
    b_qkv = jnp.concatenate(
        [params["bq"].reshape(1, H * dk),
         params["bk"].reshape(1, H * dk),
         params["bv"].reshape(1, H * dv)], axis=1)                        # (1, nqkv) f32
    w_fc = params["Wfc"].astype(jnp.bfloat16)
    w1 = params["W1"].astype(jnp.bfloat16)
    w2 = params["W2"].astype(jnp.bfloat16)

    kernel = functools.partial(encoder_layer_kernel,
                               n_head=H, d_k=dk, d_v=dv, scale=scale)

    enc_output, attn = pl.pallas_call(
        kernel,
        out_shape=(
            jax.ShapeDtypeStruct((B, S, D), jnp.float32),
            jax.ShapeDtypeStruct((H, B, S, S), jnp.float32),   # head-major, as torch
        ),
        grid_spec=pltpu.PrefetchScalarGridSpec(
            num_scalar_prefetch=0,
            grid=(B,),
            in_specs=[
                pl.BlockSpec((1, S, D), lambda b: (b, 0, 0)),       # x
                pl.BlockSpec((1, S, S), lambda b: (b, 0, 0)),       # slf_attn_mask
                pl.BlockSpec((1, S, 1), lambda b: (b, 0, 0)),       # non_pad_mask
                pl.BlockSpec((D, nqkv), lambda b: (0, 0)),          # W_qkv (bf16)
                pl.BlockSpec((1, nqkv), lambda b: (0, 0)),          # b_qkv
                pl.BlockSpec((H * dv, D), lambda b: (0, 0)),        # W_fc (bf16)
                pl.BlockSpec((1, D), lambda b: (0, 0)),             # b_fc
                pl.BlockSpec((1, D), lambda b: (0, 0)),             # LN1 gamma
                pl.BlockSpec((1, D), lambda b: (0, 0)),             # LN1 beta
                pl.BlockSpec((D, d_inner), lambda b: (0, 0)),       # W1 (bf16)
                pl.BlockSpec((1, d_inner), lambda b: (0, 0)),       # b1
                pl.BlockSpec((d_inner, D), lambda b: (0, 0)),       # W2 (bf16)
                pl.BlockSpec((1, D), lambda b: (0, 0)),             # b2
                pl.BlockSpec((1, D), lambda b: (0, 0)),             # LN2 gamma
                pl.BlockSpec((1, D), lambda b: (0, 0)),             # LN2 beta
            ],
            out_specs=[
                pl.BlockSpec((1, S, D), lambda b: (b, 0, 0)),       # enc_output
                pl.BlockSpec((H, 1, S, S), lambda b: (0, b, 0, 0)),  # attn
            ],
        ),
        compiler_params=pltpu.CompilerParams(
            dimension_semantics=("parallel",)),
    )(x, slf_attn_mask, non_pad_mask,
      w_qkv, b_qkv, w_fc, params["bfc"],
      params["ln1_g"], params["ln1_b"],
      w1, params["b1"], w2, params["b2"],
      params["ln2_g"], params["ln2_b"])

    # torch returns attn with shape (n_head * sz_b, len_q, len_k), head-major.
    enc_slf_attn = attn.reshape(H * B, S, S)
    return enc_output, enc_slf_attn


# ---------------------------------------------------------------------------
# Pure-JAX reference (same math, eval mode, f32) for validation.
# ---------------------------------------------------------------------------
def reference_forward(x, p, non_pad_mask, slf_attn_mask):
    B, S, D = x.shape
    H, dk, dv = p["n_head"], p["d_k"], p["d_v"]

    def layernorm(v, g, b):
        mu = jnp.mean(v, axis=-1, keepdims=True)
        var = jnp.mean((v - mu) ** 2, axis=-1, keepdims=True)
        return (v - mu) * jax.lax.rsqrt(var + LN_EPS) * g + b

    q = jnp.einsum("bsd,hde->bhse", x, p["Wq"]) + p["bq"][None]
    k = jnp.einsum("bsd,hde->bhse", x, p["Wk"]) + p["bk"][None]
    v = jnp.einsum("bsd,hde->bhse", x, p["Wv"]) + p["bv"][None]
    scores = jnp.einsum("bhqe,bhke->bhqk", q, k) / math.sqrt(dk)
    scores = jnp.where(slf_attn_mask[:, None] > 0, -jnp.inf, scores)
    attn = jax.nn.softmax(scores, axis=-1)
    ctx = jnp.einsum("bhqk,bhke->bhqe", attn, v)
    concat = jnp.transpose(ctx, (0, 2, 1, 3)).reshape(B, S, H * dv)
    y = concat @ p["Wfc"] + p["bfc"]
    y = layernorm(y + x, p["ln1_g"], p["ln1_b"]) * non_pad_mask
    h = jnp.maximum(y @ p["W1"] + p["b1"], 0.0)
    z = layernorm(h @ p["W2"] + p["b2"] + y, p["ln2_g"], p["ln2_b"]) * non_pad_mask
    return z, jnp.transpose(attn, (1, 0, 2, 3)).reshape(H * B, S, S)


# ---------------------------------------------------------------------------
if __name__ == "__main__":
    B, S = 2, 8
    d_model, d_inner, n_head, d_k, d_v = 32, 64, 4, 8, 8

    key = jax.random.PRNGKey(0)
    ks = jax.random.split(key, 16)

    params = {
        "n_head": n_head, "d_k": d_k, "d_v": d_v,
        "Wq": 0.1 * jax.random.normal(ks[0], (n_head, d_model, d_k), jnp.float32),
        "Wk": 0.1 * jax.random.normal(ks[1], (n_head, d_model, d_k), jnp.float32),
        "Wv": 0.1 * jax.random.normal(ks[2], (n_head, d_model, d_v), jnp.float32),
        "bq": 0.05 * jax.random.normal(ks[3], (n_head, 1, d_k), jnp.float32),
        "bk": 0.05 * jax.random.normal(ks[4], (n_head, 1, d_k), jnp.float32),
        "bv": 0.05 * jax.random.normal(ks[5], (n_head, 1, d_v), jnp.float32),
        "Wfc": 0.1 * jax.random.normal(ks[6], (n_head * d_v, d_model), jnp.float32),
        "bfc": 0.05 * jax.random.normal(ks[7], (1, d_model), jnp.float32),
        "ln1_g": 1.0 + 0.1 * jax.random.normal(ks[8], (1, d_model), jnp.float32),
        "ln1_b": 0.1 * jax.random.normal(ks[9], (1, d_model), jnp.float32),
        "W1": 0.1 * jax.random.normal(ks[10], (d_model, d_inner), jnp.float32),
        "b1": 0.05 * jax.random.normal(ks[11], (1, d_inner), jnp.float32),
        "W2": 0.1 * jax.random.normal(ks[12], (d_inner, d_model), jnp.float32),
        "b2": 0.05 * jax.random.normal(ks[13], (1, d_model), jnp.float32),
        "ln2_g": 1.0 + 0.1 * jax.random.normal(ks[14], (1, d_model), jnp.float32),
        "ln2_b": 0.1 * jax.random.normal(ks[15], (1, d_model), jnp.float32),
    }

    x = jax.random.normal(jax.random.PRNGKey(42), (B, S, d_model), jnp.float32)

    # Batch 1 has its last position padded: non_pad_mask zeroes it out, and
    # slf_attn_mask marks that key position as masked (1 == masked) for all queries.
    pad_len = jnp.array([S, S - 1])                       # valid lengths per batch
    pos = jnp.arange(S)
    non_pad = (pos[None, :] < pad_len[:, None]).astype(jnp.float32)   # (B, S)
    non_pad_mask = non_pad[:, :, None]                                 # (B, S, 1)
    slf_attn_mask = (1.0 - non_pad)[:, None, :] * jnp.ones((B, S, 1))  # (B, S, S)

    enc_out, enc_attn = encoder_layer_forward(x, params, non_pad_mask, slf_attn_mask)
    jax.block_until_ready(enc_out)
    jax.block_until_ready(enc_attn)

    ref_out, ref_attn = reference_forward(x, params, non_pad_mask, slf_attn_mask)
    assert enc_out.shape == (B, S, d_model)
    assert enc_attn.shape == (n_head * B, S, S)
    # Tolerance covers bf16 MXU inputs (f32 accumulation) vs the pure-f32 reference.
    assert jnp.allclose(enc_out, ref_out, atol=3e-2, rtol=3e-2)
    assert jnp.allclose(enc_attn, ref_attn, atol=2e-2, rtol=2e-2)

    print("KERNEL_OK")
</pallas_src>

<mosaic_0001>
module attributes {stable_mosaic.version = 11 : i64} {
  func.func @encoder_layer_kernel(%arg0: i32, %arg1: memref<1x8x32xf32, #tpu.memory_space<vmem>>, %arg2: memref<1x8x8xf32, #tpu.memory_space<vmem>>, %arg3: memref<1x8x1xf32, #tpu.memory_space<vmem>>, %arg4: memref<32x96xbf16, #tpu.memory_space<vmem>>, %arg5: memref<1x96xf32, #tpu.memory_space<vmem>>, %arg6: memref<32x32xbf16, #tpu.memory_space<vmem>>, %arg7: memref<1x32xf32, #tpu.memory_space<vmem>>, %arg8: memref<1x32xf32, #tpu.memory_space<vmem>>, %arg9: memref<1x32xf32, #tpu.memory_space<vmem>>, %arg10: memref<32x64xbf16, #tpu.memory_space<vmem>>, %arg11: memref<1x64xf32, #tpu.memory_space<vmem>>, %arg12: memref<64x32xbf16, #tpu.memory_space<vmem>>, %arg13: memref<1x32xf32, #tpu.memory_space<vmem>>, %arg14: memref<1x32xf32, #tpu.memory_space<vmem>>, %arg15: memref<1x32xf32, #tpu.memory_space<vmem>>, %arg16: memref<1x8x32xf32, #tpu.memory_space<vmem>>, %arg17: memref<4x1x8x8xf32, #tpu.memory_space<vmem>>) attributes {dimension_semantics = [#tpu.dimension_semantics<parallel>], iteration_bounds = array<i64: 2>, scalar_prefetch = 0 : i64, scratch_operands = 0 : i64, tpu.core_type = #tpu.core_type<tc>, window_params = [{transform_indices = @transform_0, window_bounds = array<i64: 1, 8, 32>}, {transform_indices = @transform_1, window_bounds = array<i64: 1, 8, 8>}, {transform_indices = @transform_2, window_bounds = array<i64: 1, 8, 1>}, {pipeline_mode = #tpu.pipeline_mode<synchronous>, transform_indices = @transform_3, window_bounds = array<i64: 32, 96>}, {pipeline_mode = #tpu.pipeline_mode<synchronous>, transform_indices = @transform_4, window_bounds = array<i64: 1, 96>}, {pipeline_mode = #tpu.pipeline_mode<synchronous>, transform_indices = @transform_5, window_bounds = array<i64: 32, 32>}, {pipeline_mode = #tpu.pipeline_mode<synchronous>, transform_indices = @transform_6, window_bounds = array<i64: 1, 32>}, {pipeline_mode = #tpu.pipeline_mode<synchronous>, transform_indices = @transform_7, window_bounds = array<i64: 1, 32>}, {pipeline_mode = #tpu.pipeline_mode<synchronous>, transform_indices = @transform_8, window_bounds = array<i64: 1, 32>}, {pipeline_mode = #tpu.pipeline_mode<synchronous>, transform_indices = @transform_9, window_bounds = array<i64: 32, 64>}, {pipeline_mode = #tpu.pipeline_mode<synchronous>, transform_indices = @transform_10, window_bounds = array<i64: 1, 64>}, {pipeline_mode = #tpu.pipeline_mode<synchronous>, transform_indices = @transform_11, window_bounds = array<i64: 64, 32>}, {pipeline_mode = #tpu.pipeline_mode<synchronous>, transform_indices = @transform_12, window_bounds = array<i64: 1, 32>}, {pipeline_mode = #tpu.pipeline_mode<synchronous>, transform_indices = @transform_13, window_bounds = array<i64: 1, 32>}, {pipeline_mode = #tpu.pipeline_mode<synchronous>, transform_indices = @transform_14, window_bounds = array<i64: 1, 32>}, {transform_indices = @transform_15, window_bounds = array<i64: 1, 8, 32>}, {transform_indices = @transform_16, window_bounds = array<i64: 4, 1, 8, 8>}]} {
    %c0 = arith.constant 0 : index
    %c0_0 = arith.constant 0 : index
    %c0_1 = arith.constant 0 : index
    %0 = vector.load %arg1[%c0, %c0_0, %c0_1] : memref<1x8x32xf32, #tpu.memory_space<vmem>>, vector<1x8x32xf32>
    %1 = vector.shape_cast %0 : vector<1x8x32xf32> to vector<8x32xf32>
    %c0_2 = arith.constant 0 : index
    %c0_3 = arith.constant 0 : index
    %c0_4 = arith.constant 0 : index
    %2 = vector.load %arg3[%c0_2, %c0_3, %c0_4] : memref<1x8x1xf32, #tpu.memory_space<vmem>>, vector<1x8x1xf32>
    %3 = vector.shape_cast %2 : vector<1x8x1xf32> to vector<8x1xf32>
    %c0_5 = arith.constant 0 : index
    %c0_6 = arith.constant 0 : index
    %c0_7 = arith.constant 0 : index
    %4 = vector.load %arg2[%c0_5, %c0_6, %c0_7] : memref<1x8x8xf32, #tpu.memory_space<vmem>>, vector<1x8x8xf32>
    %5 = vector.shape_cast %4 : vector<1x8x8xf32> to vector<8x8xf32>
    %cst = arith.constant 0.000000e+00 : f32
    %6 = vector.broadcast %cst : f32 to vector<8x8xf32>
    %7 = arith.cmpf ogt, %5, %6 : vector<8x8xf32>
    %cst_8 = arith.constant -1.000000e+30 : f32
    %cst_9 = arith.constant 0.000000e+00 : f32
    %8 = vector.broadcast %cst_8 : f32 to vector<8x8xf32>
    %9 = vector.broadcast %cst_9 : f32 to vector<8x8xf32>
    %10 = arith.select %7, %8, %9 : vector<8x8xi1>, vector<8x8xf32>
    %11 = arith.truncf %1 : vector<8x32xf32> to vector<8x32xbf16>
    %c0_10 = arith.constant 0 : index
    %c0_11 = arith.constant 0 : index
    %12 = vector.load %arg4[%c0_10, %c0_11] : memref<32x96xbf16, #tpu.memory_space<vmem>>, vector<32x96xbf16>
    %cst_12 = arith.constant dense<0.000000e+00> : vector<8x96xf32>
    %13 = tpu.matmul %11, %12, %cst_12 {dimension_numbers = #tpu.dot_dimension_numbers<[1], [0], [0], [1], [0, 0, 1, 1], [], []>} : vector<8x32xbf16>, vector<32x96xbf16>, vector<8x96xf32> -> vector<8x96xf32>
    %c0_13 = arith.constant 0 : index
    %c0_14 = arith.constant 0 : index
    %14 = vector.load %arg5[%c0_13, %c0_14] : memref<1x96xf32, #tpu.memory_space<vmem>>, vector<1x96xf32>
    %15 = vector.broadcast %14 : vector<1x96xf32> to vector<8x96xf32>
    %16 = arith.addf %13, %15 : vector<8x96xf32>
    %17 = vector.extract_strided_slice %16 {offsets = [0, 0], sizes = [8, 8], strides = [1, 1]} : vector<8x96xf32> to vector<8x8xf32>
    %cst_15 = arith.constant 0.353553385 : f32
    %18 = vector.broadcast %cst_15 : f32 to vector<8x8xf32>
    %19 = arith.mulf %17, %18 : vector<8x8xf32>
    %20 = vector.extract_strided_slice %16 {offsets = [0, 32], sizes = [8, 8], strides = [1, 1]} : vector<8x96xf32> to vector<8x8xf32>
    %21 = vector.extract_strided_slice %16 {offsets = [0, 64], sizes = [8, 8], strides = [1, 1]} : vector<8x96xf32> to vector<8x8xf32>
    %22 = arith.truncf %19 : vector<8x8xf32> to vector<8x8xbf16>
    %23 = arith.truncf %20 : vector<8x8xf32> to vector<8x8xbf16>
    %24 = tpu.transpose %23, [1, 0] : vector<8x8xbf16> -> vector<8x8xbf16>
    %cst_16 = arith.constant dense<0.000000e+00> : vector<8x8xf32>
    %25 = tpu.matmul %22, %24, %cst_16 {dimension_numbers = #tpu.dot_dimension_numbers<[1], [0], [0], [1], [0, 0, 1, 1], [], []>} : vector<8x8xbf16>, vector<8x8xbf16>, vector<8x8xf32> -> vector<8x8xf32>
    %26 = arith.addf %25, %10 : vector<8x8xf32>
    %cst_17 = arith.constant dense<0xFF800000> : vector<8xf32>
    %27 = vector.multi_reduction <maximumf>, %26, %cst_17 [1] : vector<8x8xf32> to vector<8xf32>
    %28 = vector.shape_cast %27 : vector<8xf32> to vector<8x1xf32>
    %29 = vector.broadcast %28 : vector<8x1xf32> to vector<8x8xf32>
    %30 = arith.subf %26, %29 : vector<8x8xf32>
    %31 = math.exp %30 : vector<8x8xf32>
    %cst_18 = arith.constant dense<0.000000e+00> : vector<8xf32>
    %32 = vector.multi_reduction <add>, %31, %cst_18 [1] : vector<8x8xf32> to vector<8xf32>
    %33 = vector.shape_cast %32 : vector<8xf32> to vector<8x1xf32>
    %34 = tpu.reciprocal %33 {approx = true} : vector<8x1xf32> -> vector<8x1xf32>
    %35 = vector.broadcast %34 : vector<8x1xf32> to vector<8x8xf32>
    %36 = arith.mulf %31, %35 : vector<8x8xf32>
    %c0_19 = arith.constant 0 : index
    %c0_20 = arith.constant 0 : index
    %c0_21 = arith.constant 0 : index
    %c0_22 = arith.constant 0 : index
    %37 = vector.load %arg17[%c0_19, %c0_20, %c0_21, %c0_22] : memref<4x1x8x8xf32, #tpu.memory_space<vmem>>, vector<1x1x8x8xf32>
    %38 = vector.shape_cast %37 : vector<1x1x8x8xf32> to vector<8x8xf32>
    %39 = vector.shape_cast %36 : vector<8x8xf32> to vector<1x1x8x8xf32>
    tpu.vector_store %arg17[%c0_19, %c0_20, %c0_21, %c0_22], %39 {strides = array<i32>} : memref<4x1x8x8xf32, #tpu.memory_space<vmem>>, vector<1x1x8x8xf32>,
    %40 = arith.truncf %36 : vector<8x8xf32> to vector<8x8xbf16>
    %41 = arith.truncf %21 : vector<8x8xf32> to vector<8x8xbf16>
    %cst_23 = arith.constant dense<0.000000e+00> : vector<8x8xf32>
    %42 = tpu.matmul %40, %41, %cst_23 {dimension_numbers = #tpu.dot_dimension_numbers<[1], [0], [0], [1], [0, 0, 1, 1], [], []>} : vector<8x8xbf16>, vector<8x8xbf16>, vector<8x8xf32> -> vector<8x8xf32>
    %43 = vector.extract_strided_slice %16 {offsets = [0, 8], sizes = [8, 8], strides = [1, 1]} : vector<8x96xf32> to vector<8x8xf32>
    %cst_24 = arith.constant 0.353553385 : f32
    %44 = vector.broadcast %cst_24 : f32 to vector<8x8xf32>
    %45 = arith.mulf %43, %44 : vector<8x8xf32>
    %46 = vector.extract_strided_slice %16 {offsets = [0, 40], sizes = [8, 8], strides = [1, 1]} : vector<8x96xf32> to vector<8x8xf32>
    %47 = vector.extract_strided_slice %16 {offsets = [0, 72], sizes = [8, 8], strides = [1, 1]} : vector<8x96xf32> to vector<8x8xf32>
    %48 = arith.truncf %45 : vector<8x8xf32> to vector<8x8xbf16>
    %49 = arith.truncf %46 : vector<8x8xf32> to vector<8x8xbf16>
    %50 = tpu.transpose %49, [1, 0] : vector<8x8xbf16> -> vector<8x8xbf16>
    %cst_25 = arith.constant dense<0.000000e+00> : vector<8x8xf32>
    %51 = tpu.matmul %48, %50, %cst_25 {dimension_numbers = #tpu.dot_dimension_numbers<[1], [0], [0], [1], [0, 0, 1, 1], [], []>} : vector<8x8xbf16>, vector<8x8xbf16>, vector<8x8xf32> -> vector<8x8xf32>
    %52 = arith.addf %51, %10 : vector<8x8xf32>
    %cst_26 = arith.constant dense<0xFF800000> : vector<8xf32>
    %53 = vector.multi_reduction <maximumf>, %52, %cst_26 [1] : vector<8x8xf32> to vector<8xf32>
    %54 = vector.shape_cast %53 : vector<8xf32> to vector<8x1xf32>
    %55 = vector.broadcast %54 : vector<8x1xf32> to vector<8x8xf32>
    %56 = arith.subf %52, %55 : vector<8x8xf32>
    %57 = math.exp %56 : vector<8x8xf32>
    %cst_27 = arith.constant dense<0.000000e+00> : vector<8xf32>
    %58 = vector.multi_reduction <add>, %57, %cst_27 [1] : vector<8x8xf32> to vector<8xf32>
    %59 = vector.shape_cast %58 : vector<8xf32> to vector<8x1xf32>
    %60 = tpu.reciprocal %59 {approx = true} : vector<8x1xf32> -> vector<8x1xf32>
    %61 = vector.broadcast %60 : vector<8x1xf32> to vector<8x8xf32>
    %62 = arith.mulf %57, %61 : vector<8x8xf32>
    %c1 = arith.constant 1 : index
    %c0_28 = arith.constant 0 : index
    %c0_29 = arith.constant 0 : index
    %c0_30 = arith.constant 0 : index
    %63 = vector.load %arg17[%c1, %c0_28, %c0_29, %c0_30] : memref<4x1x8x8xf32, #tpu.memory_space<vmem>>, vector<1x1x8x8xf32>
    %64 = vector.shape_cast %63 : vector<1x1x8x8xf32> to vector<8x8xf32>
    %65 = vector.shape_cast %62 : vector<8x8xf32> to vector<1x1x8x8xf32>
    tpu.vector_store %arg17[%c1, %c0_28, %c0_29, %c0_30], %65 {strides = array<i32>} : memref<4x1x8x8xf32, #tpu.memory_space<vmem>>, vector<1x1x8x8xf32>,
    %66 = arith.truncf %62 : vector<8x8xf32> to vector<8x8xbf16>
    %67 = arith.truncf %47 : vector<8x8xf32> to vector<8x8xbf16>
    %cst_31 = arith.constant dense<0.000000e+00> : vector<8x8xf32>
    %68 = tpu.matmul %66, %67, %cst_31 {dimension_numbers = #tpu.dot_dimension_numbers<[1], [0], [0], [1], [0, 0, 1, 1], [], []>} : vector<8x8xbf16>, vector<8x8xbf16>, vector<8x8xf32> -> vector<8x8xf32>
    %69 = vector.extract_strided_slice %16 {offsets = [0, 16], sizes = [8, 8], strides = [1, 1]} : vector<8x96xf32> to vector<8x8xf32>
    %cst_32 = arith.constant 0.353553385 : f32
    %70 = vector.broadcast %cst_32 : f32 to vector<8x8xf32>
    %71 = arith.mulf %69, %70 : vector<8x8xf32>
    %72 = vector.extract_strided_slice %16 {offsets = [0, 48], sizes = [8, 8], strides = [1, 1]} : vector<8x96xf32> to vector<8x8xf32>
    %73 = vector.extract_strided_slice %16 {offsets = [0, 80], sizes = [8, 8], strides = [1, 1]} : vector<8x96xf32> to vector<8x8xf32>
    %74 = arith.truncf %71 : vector<8x8xf32> to vector<8x8xbf16>
    %75 = arith.truncf %72 : vector<8x8xf32> to vector<8x8xbf16>
    %76 = tpu.transpose %75, [1, 0] : vector<8x8xbf16> -> vector<8x8xbf16>
    %cst_33 = arith.constant dense<0.000000e+00> : vector<8x8xf32>
    %77 = tpu.matmul %74, %76, %cst_33 {dimension_numbers = #tpu.dot_dimension_numbers<[1], [0], [0], [1], [0, 0, 1, 1], [], []>} : vector<8x8xbf16>, vector<8x8xbf16>, vector<8x8xf32> -> vector<8x8xf32>
    %78 = arith.addf %77, %10 : vector<8x8xf32>
    %cst_34 = arith.constant dense<0xFF800000> : vector<8xf32>
    %79 = vector.multi_reduction <maximumf>, %78, %cst_34 [1] : vector<8x8xf32> to vector<8xf32>
    %80 = vector.shape_cast %79 : vector<8xf32> to vector<8x1xf32>
    %81 = vector.broadcast %80 : vector<8x1xf32> to vector<8x8xf32>
    %82 = arith.subf %78, %81 : vector<8x8xf32>
    %83 = math.exp %82 : vector<8x8xf32>
    %cst_35 = arith.constant dense<0.000000e+00> : vector<8xf32>
    %84 = vector.multi_reduction <add>, %83, %cst_35 [1] : vector<8x8xf32> to vector<8xf32>
    %85 = vector.shape_cast %84 : vector<8xf32> to vector<8x1xf32>
    %86 = tpu.reciprocal %85 {approx = true} : vector<8x1xf32> -> vector<8x1xf32>
    %87 = vector.broadcast %86 : vector<8x1xf32> to vector<8x8xf32>
    %88 = arith.mulf %83, %87 : vector<8x8xf32>
    %c2 = arith.constant 2 : index
    %c0_36 = arith.constant 0 : index
    %c0_37 = arith.constant 0 : index
    %c0_38 = arith.constant 0 : index
    %89 = vector.load %arg17[%c2, %c0_36, %c0_37, %c0_38] : memref<4x1x8x8xf32, #tpu.memory_space<vmem>>, vector<1x1x8x8xf32>
    %90 = vector.shape_cast %89 : vector<1x1x8x8xf32> to vector<8x8xf32>
    %91 = vector.shape_cast %88 : vector<8x8xf32> to vector<1x1x8x8xf32>
    tpu.vector_store %arg17[%c2, %c0_36, %c0_37, %c0_38], %91 {strides = array<i32>} : memref<4x1x8x8xf32, #tpu.memory_space<vmem>>, vector<1x1x8x8xf32>,
    %92 = arith.truncf %88 : vector<8x8xf32> to vector<8x8xbf16>
    %93 = arith.truncf %73 : vector<8x8xf32> to vector<8x8xbf16>
    %cst_39 = arith.constant dense<0.000000e+00> : vector<8x8xf32>
    %94 = tpu.matmul %92, %93, %cst_39 {dimension_numbers = #tpu.dot_dimension_numbers<[1], [0], [0], [1], [0, 0, 1, 1], [], []>} : vector<8x8xbf16>, vector<8x8xbf16>, vector<8x8xf32> -> vector<8x8xf32>
    %95 = vector.extract_strided_slice %16 {offsets = [0, 24], sizes = [8, 8], strides = [1, 1]} : vector<8x96xf32> to vector<8x8xf32>
    %cst_40 = arith.constant 0.353553385 : f32
    %96 = vector.broadcast %cst_40 : f32 to vector<8x8xf32>
    %97 = arith.mulf %95, %96 : vector<8x8xf32>
    %98 = vector.extract_strided_slice %16 {offsets = [0, 56], sizes = [8, 8], strides = [1, 1]} : vector<8x96xf32> to vector<8x8xf32>
    %99 = vector.extract_strided_slice %16 {offsets = [0, 88], sizes = [8, 8], strides = [1, 1]} : vector<8x96xf32> to vector<8x8xf32>
    %100 = arith.truncf %97 : vector<8x8xf32> to vector<8x8xbf16>
    %101 = arith.truncf %98 : vector<8x8xf32> to vector<8x8xbf16>
    %102 = tpu.transpose %101, [1, 0] : vector<8x8xbf16> -> vector<8x8xbf16>
    %cst_41 = arith.constant dense<0.000000e+00> : vector<8x8xf32>
    %103 = tpu.matmul %100, %102, %cst_41 {dimension_numbers = #tpu.dot_dimension_numbers<[1], [0], [0], [1], [0, 0, 1, 1], [], []>} : vector<8x8xbf16>, vector<8x8xbf16>, vector<8x8xf32> -> vector<8x8xf32>
    %104 = arith.addf %103, %10 : vector<8x8xf32>
    %cst_42 = arith.constant dense<0xFF800000> : vector<8xf32>
    %105 = vector.multi_reduction <maximumf>, %104, %cst_42 [1] : vector<8x8xf32> to vector<8xf32>
    %106 = vector.shape_cast %105 : vector<8xf32> to vector<8x1xf32>
    %107 = vector.broadcast %106 : vector<8x1xf32> to vector<8x8xf32>
    %108 = arith.subf %104, %107 : vector<8x8xf32>
    %109 = math.exp %108 : vector<8x8xf32>
    %cst_43 = arith.constant dense<0.000000e+00> : vector<8xf32>
    %110 = vector.multi_reduction <add>, %109, %cst_43 [1] : vector<8x8xf32> to vector<8xf32>
    %111 = vector.shape_cast %110 : vector<8xf32> to vector<8x1xf32>
    %112 = tpu.reciprocal %111 {approx = true} : vector<8x1xf32> -> vector<8x1xf32>
    %113 = vector.broadcast %112 : vector<8x1xf32> to vector<8x8xf32>
    %114 = arith.mulf %109, %113 : vector<8x8xf32>
    %c3 = arith.constant 3 : index
    %c0_44 = arith.constant 0 : index
    %c0_45 = arith.constant 0 : index
    %c0_46 = arith.constant 0 : index
    %115 = vector.load %arg17[%c3, %c0_44, %c0_45, %c0_46] : memref<4x1x8x8xf32, #tpu.memory_space<vmem>>, vector<1x1x8x8xf32>
    %116 = vector.shape_cast %115 : vector<1x1x8x8xf32> to vector<8x8xf32>
    %117 = vector.shape_cast %114 : vector<8x8xf32> to vector<1x1x8x8xf32>
    tpu.vector_store %arg17[%c3, %c0_44, %c0_45, %c0_46], %117 {strides = array<i32>} : memref<4x1x8x8xf32, #tpu.memory_space<vmem>>, vector<1x1x8x8xf32>,
    %118 = arith.truncf %114 : vector<8x8xf32> to vector<8x8xbf16>
    %119 = arith.truncf %99 : vector<8x8xf32> to vector<8x8xbf16>
    %cst_47 = arith.constant dense<0.000000e+00> : vector<8x8xf32>
    %120 = tpu.matmul %118, %119, %cst_47 {dimension_numbers = #tpu.dot_dimension_numbers<[1], [0], [0], [1], [0, 0, 1, 1], [], []>} : vector<8x8xbf16>, vector<8x8xbf16>, vector<8x8xf32> -> vector<8x8xf32>
    %121 = tpu.concatenate %42, %68, %94, %120 in 1 : vector<8x8xf32>, vector<8x8xf32>, vector<8x8xf32>, vector<8x8xf32> -> vector<8x32xf32>
    %122 = arith.truncf %121 : vector<8x32xf32> to vector<8x32xbf16>
    %c0_48 = arith.constant 0 : index
    %c0_49 = arith.constant 0 : index
    %123 = vector.load %arg6[%c0_48, %c0_49] : memref<32x32xbf16, #tpu.memory_space<vmem>>, vector<32x32xbf16>
    %cst_50 = arith.constant dense<0.000000e+00> : vector<8x32xf32>
    %124 = tpu.matmul %122, %123, %cst_50 {dimension_numbers = #tpu.dot_dimension_numbers<[1], [0], [0], [1], [0, 0, 1, 1], [], []>} : vector<8x32xbf16>, vector<32x32xbf16>, vector<8x32xf32> -> vector<8x32xf32>
    %c0_51 = arith.constant 0 : index
    %c0_52 = arith.constant 0 : index
    %125 = vector.load %arg7[%c0_51, %c0_52] : memref<1x32xf32, #tpu.memory_space<vmem>>, vector<1x32xf32>
    %126 = vector.broadcast %125 : vector<1x32xf32> to vector<8x32xf32>
    %127 = arith.addf %124, %126 : vector<8x32xf32>
    %128 = arith.addf %127, %1 : vector<8x32xf32>
    %c0_53 = arith.constant 0 : index
    %c0_54 = arith.constant 0 : index
    %129 = vector.load %arg8[%c0_53, %c0_54] : memref<1x32xf32, #tpu.memory_space<vmem>>, vector<1x32xf32>
    %c0_55 = arith.constant 0 : index
    %c0_56 = arith.constant 0 : index
    %130 = vector.load %arg9[%c0_55, %c0_56] : memref<1x32xf32, #tpu.memory_space<vmem>>, vector<1x32xf32>
    %cst_57 = arith.constant dense<0.000000e+00> : vector<8xf32>
    %131 = vector.multi_reduction <add>, %128, %cst_57 [1] : vector<8x32xf32> to vector<8xf32>
    %132 = vector.shape_cast %131 : vector<8xf32> to vector<8x1xf32>
    %cst_58 = arith.constant 3.200000e+01 : f32
    %133 = vector.broadcast %cst_58 : f32 to vector<8x1xf32>
    %134 = arith.divf %132, %133 : vector<8x1xf32>
    %135 = vector.broadcast %134 : vector<8x1xf32> to vector<8x32xf32>
    %136 = arith.subf %128, %135 : vector<8x32xf32>
    %137 = arith.mulf %136, %136 : vector<8x32xf32>
    %cst_59 = arith.constant dense<0.000000e+00> : vector<8xf32>
    %138 = vector.multi_reduction <add>, %137, %cst_59 [1] : vector<8x32xf32> to vector<8xf32>
    %139 = vector.shape_cast %138 : vector<8xf32> to vector<8x1xf32>
    %cst_60 = arith.constant 3.200000e+01 : f32
    %140 = vector.broadcast %cst_60 : f32 to vector<8x1xf32>
    %141 = arith.divf %139, %140 : vector<8x1xf32>
    %142 = vector.broadcast %134 : vector<8x1xf32> to vector<8x32xf32>
    %143 = arith.subf %128, %142 : vector<8x32xf32>
    %cst_61 = arith.constant 9.99999974E-6 : f32
    %144 = vector.broadcast %cst_61 : f32 to vector<8x1xf32>
    %145 = arith.addf %141, %144 : vector<8x1xf32>
    %146 = math.rsqrt %145 : vector<8x1xf32>
    %147 = vector.broadcast %146 : vector<8x1xf32> to vector<8x32xf32>
    %148 = arith.mulf %143, %147 : vector<8x32xf32>
    %149 = vector.broadcast %129 : vector<1x32xf32> to vector<8x32xf32>
    %150 = arith.mulf %148, %149 : vector<8x32xf32>
    %151 = vector.broadcast %130 : vector<1x32xf32> to vector<8x32xf32>
    %152 = arith.addf %150, %151 : vector<8x32xf32>
    %153 = vector.broadcast %3 : vector<8x1xf32> to vector<8x32xf32>
    %154 = arith.mulf %152, %153 : vector<8x32xf32>
    %155 = arith.truncf %154 : vector<8x32xf32> to vector<8x32xbf16>
    %c0_62 = arith.constant 0 : index
    %c0_63 = arith.constant 0 : index
    %156 = vector.load %arg10[%c0_62, %c0_63] : memref<32x64xbf16, #tpu.memory_space<vmem>>, vector<32x64xbf16>
    %cst_64 = arith.constant dense<0.000000e+00> : vector<8x64xf32>
    %157 = tpu.matmul %155, %156, %cst_64 {dimension_numbers = #tpu.dot_dimension_numbers<[1], [0], [0], [1], [0, 0, 1, 1], [], []>} : vector<8x32xbf16>, vector<32x64xbf16>, vector<8x64xf32> -> vector<8x64xf32>
    %c0_65 = arith.constant 0 : index
    %c0_66 = arith.constant 0 : index
    %158 = vector.load %arg11[%c0_65, %c0_66] : memref<1x64xf32, #tpu.memory_space<vmem>>, vector<1x64xf32>
    %159 = vector.broadcast %158 : vector<1x64xf32> to vector<8x64xf32>
    %160 = arith.addf %157, %159 : vector<8x64xf32>
    %cst_67 = arith.constant 0.000000e+00 : f32
    %161 = vector.broadcast %cst_67 : f32 to vector<8x64xf32>
    %162 = arith.maximumf %160, %161 : vector<8x64xf32>
    %163 = arith.truncf %162 : vector<8x64xf32> to vector<8x64xbf16>
    %c0_68 = arith.constant 0 : index
    %c0_69 = arith.constant 0 : index
    %164 = vector.load %arg12[%c0_68, %c0_69] : memref<64x32xbf16, #tpu.memory_space<vmem>>, vector<64x32xbf16>
    %cst_70 = arith.constant dense<0.000000e+00> : vector<8x32xf32>
    %165 = tpu.matmul %163, %164, %cst_70 {dimension_numbers = #tpu.dot_dimension_numbers<[1], [0], [0], [1], [0, 0, 1, 1], [], []>} : vector<8x64xbf16>, vector<64x32xbf16>, vector<8x32xf32> -> vector<8x32xf32>
    %c0_71 = arith.constant 0 : index
    %c0_72 = arith.constant 0 : index
    %166 = vector.load %arg13[%c0_71, %c0_72] : memref<1x32xf32, #tpu.memory_space<vmem>>, vector<1x32xf32>
    %167 = vector.broadcast %166 : vector<1x32xf32> to vector<8x32xf32>
    %168 = arith.addf %165, %167 : vector<8x32xf32>
    %169 = arith.addf %168, %154 : vector<8x32xf32>
    %c0_73 = arith.constant 0 : index
    %c0_74 = arith.constant 0 : index
    %170 = vector.load %arg14[%c0_73, %c0_74] : memref<1x32xf32, #tpu.memory_space<vmem>>, vector<1x32xf32>
    %c0_75 = arith.constant 0 : index
    %c0_76 = arith.constant 0 : index
    %171 = vector.load %arg15[%c0_75, %c0_76] : memref<1x32xf32, #tpu.memory_space<vmem>>, vector<1x32xf32>
    %cst_77 = arith.constant dense<0.000000e+00> : vector<8xf32>
    %172 = vector.multi_reduction <add>, %169, %cst_77 [1] : vector<8x32xf32> to vector<8xf32>
    %173 = vector.shape_cast %172 : vector<8xf32> to vector<8x1xf32>
    %cst_78 = arith.constant 3.200000e+01 : f32
    %174 = vector.broadcast %cst_78 : f32 to vector<8x1xf32>
    %175 = arith.divf %173, %174 : vector<8x1xf32>
    %176 = vector.broadcast %175 : vector<8x1xf32> to vector<8x32xf32>
    %177 = arith.subf %169, %176 : vector<8x32xf32>
    %178 = arith.mulf %177, %177 : vector<8x32xf32>
    %cst_79 = arith.constant dense<0.000000e+00> : vector<8xf32>
    %179 = vector.multi_reduction <add>, %178, %cst_79 [1] : vector<8x32xf32> to vector<8xf32>
    %180 = vector.shape_cast %179 : vector<8xf32> to vector<8x1xf32>
    %cst_80 = arith.constant 3.200000e+01 : f32
    %181 = vector.broadcast %cst_80 : f32 to vector<8x1xf32>
    %182 = arith.divf %180, %181 : vector<8x1xf32>
    %183 = vector.broadcast %175 : vector<8x1xf32> to vector<8x32xf32>
    %184 = arith.subf %169, %183 : vector<8x32xf32>
    %cst_81 = arith.constant 9.99999974E-6 : f32
    %185 = vector.broadcast %cst_81 : f32 to vector<8x1xf32>
    %186 = arith.addf %182, %185 : vector<8x1xf32>
    %187 = math.rsqrt %186 : vector<8x1xf32>
    %188 = vector.broadcast %187 : vector<8x1xf32> to vector<8x32xf32>
    %189 = arith.mulf %184, %188 : vector<8x32xf32>
    %190 = vector.broadcast %170 : vector<1x32xf32> to vector<8x32xf32>
    %191 = arith.mulf %189, %190 : vector<8x32xf32>
    %192 = vector.broadcast %171 : vector<1x32xf32> to vector<8x32xf32>
    %193 = arith.addf %191, %192 : vector<8x32xf32>
    %194 = vector.broadcast %3 : vector<8x1xf32> to vector<8x32xf32>
    %195 = arith.mulf %193, %194 : vector<8x32xf32>
    %c0_82 = arith.constant 0 : index
    %c0_83 = arith.constant 0 : index
    %c0_84 = arith.constant 0 : index
    %196 = vector.load %arg16[%c0_82, %c0_83, %c0_84] : memref<1x8x32xf32, #tpu.memory_space<vmem>>, vector<1x8x32xf32>
    %197 = vector.shape_cast %196 : vector<1x8x32xf32> to vector<8x32xf32>
    %198 = vector.shape_cast %195 : vector<8x32xf32> to vector<1x8x32xf32>
    tpu.vector_store %arg16[%c0_82, %c0_83, %c0_84], %198 {strides = array<i32>} : memref<1x8x32xf32, #tpu.memory_space<vmem>>, vector<1x8x32xf32>,
    return
  }
  func.func @transform_0(%arg0: i32) -> (i32, i32, i32) {
    %c0_i32 = arith.constant 0 : i32
    %c0_i32_0 = arith.constant 0 : i32
    %c0_i32_1 = arith.constant 0 : i32
    return %arg0, %c0_i32, %c0_i32_0 : i32, i32, i32
  }
  func.func @transform_1(%arg0: i32) -> (i32, i32, i32) {
    %c0_i32 = arith.constant 0 : i32
    %c0_i32_0 = arith.constant 0 : i32
    %c0_i32_1 = arith.constant 0 : i32
    return %arg0, %c0_i32, %c0_i32_0 : i32, i32, i32
  }
  func.func @transform_2(%arg0: i32) -> (i32, i32, i32) {
    %c0_i32 = arith.constant 0 : i32
    %c0_i32_0 = arith.constant 0 : i32
    %c0_i32_1 = arith.constant 0 : i32
    return %arg0, %c0_i32, %c0_i32_0 : i32, i32, i32
  }
  func.func @transform_3(%arg0: i32) -> (i32, i32) {
    %c0_i32 = arith.constant 0 : i32
    %c0_i32_0 = arith.constant 0 : i32
    %c0_i32_1 = arith.constant 0 : i32
    return %c0_i32, %c0_i32_0 : i32, i32
  }
  func.func @transform_4(%arg0: i32) -> (i32, i32) {
    %c0_i32 = arith.constant 0 : i32
    %c0_i32_0 = arith.constant 0 : i32
    %c0_i32_1 = arith.constant 0 : i32
    return %c0_i32, %c0_i32_0 : i32, i32
  }
  func.func @transform_5(%arg0: i32) -> (i32, i32) {
    %c0_i32 = arith.constant 0 : i32
    %c0_i32_0 = arith.constant 0 : i32
    %c0_i32_1 = arith.constant 0 : i32
    return %c0_i32, %c0_i32_0 : i32, i32
  }
  func.func @transform_6(%arg0: i32) -> (i32, i32) {
    %c0_i32 = arith.constant 0 : i32
    %c0_i32_0 = arith.constant 0 : i32
    %c0_i32_1 = arith.constant 0 : i32
    return %c0_i32, %c0_i32_0 : i32, i32
  }
  func.func @transform_7(%arg0: i32) -> (i32, i32) {
    %c0_i32 = arith.constant 0 : i32
    %c0_i32_0 = arith.constant 0 : i32
    %c0_i32_1 = arith.constant 0 : i32
    return %c0_i32, %c0_i32_0 : i32, i32
  }
  func.func @transform_8(%arg0: i32) -> (i32, i32) {
    %c0_i32 = arith.constant 0 : i32
    %c0_i32_0 = arith.constant 0 : i32
    %c0_i32_1 = arith.constant 0 : i32
    return %c0_i32, %c0_i32_0 : i32, i32
  }
  func.func @transform_9(%arg0: i32) -> (i32, i32) {
    %c0_i32 = arith.constant 0 : i32
    %c0_i32_0 = arith.constant 0 : i32
    %c0_i32_1 = arith.constant 0 : i32
    return %c0_i32, %c0_i32_0 : i32, i32
  }
  func.func @transform_10(%arg0: i32) -> (i32, i32) {
    %c0_i32 = arith.constant 0 : i32
    %c0_i32_0 = arith.constant 0 : i32
    %c0_i32_1 = arith.constant 0 : i32
    return %c0_i32, %c0_i32_0 : i32, i32
  }
  func.func @transform_11(%arg0: i32) -> (i32, i32) {
    %c0_i32 = arith.constant 0 : i32
    %c0_i32_0 = arith.constant 0 : i32
    %c0_i32_1 = arith.constant 0 : i32
    return %c0_i32, %c0_i32_0 : i32, i32
  }
  func.func @transform_12(%arg0: i32) -> (i32, i32) {
    %c0_i32 = arith.constant 0 : i32
    %c0_i32_0 = arith.constant 0 : i32
    %c0_i32_1 = arith.constant 0 : i32
    return %c0_i32, %c0_i32_0 : i32, i32
  }
  func.func @transform_13(%arg0: i32) -> (i32, i32) {
    %c0_i32 = arith.constant 0 : i32
    %c0_i32_0 = arith.constant 0 : i32
    %c0_i32_1 = arith.constant 0 : i32
    return %c0_i32, %c0_i32_0 : i32, i32
  }
  func.func @transform_14(%arg0: i32) -> (i32, i32) {
    %c0_i32 = arith.constant 0 : i32
    %c0_i32_0 = arith.constant 0 : i32
    %c0_i32_1 = arith.constant 0 : i32
    return %c0_i32, %c0_i32_0 : i32, i32
  }
  func.func @transform_15(%arg0: i32) -> (i32, i32, i32) {
    %c0_i32 = arith.constant 0 : i32
    %c0_i32_0 = arith.constant 0 : i32
    %c0_i32_1 = arith.constant 0 : i32
    return %arg0, %c0_i32, %c0_i32_0 : i32, i32, i32
  }
  func.func @transform_16(%arg0: i32) -> (i32, i32, i32, i32) {
    %c0_i32 = arith.constant 0 : i32
    %c0_i32_0 = arith.constant 0 : i32
    %c0_i32_1 = arith.constant 0 : i32
    %c0_i32_2 = arith.constant 0 : i32
    return %c0_i32, %arg0, %c0_i32_0, %c0_i32_1 : i32, i32, i32, i32
  }
}

</mosaic_0001>

<bundles_post_ra>
// kernel: tpu_custom_call.1
= control target key start
LH: loop header
LB: loop body
LE: loop exit
PB: predicated region body
PF: predicated region fallthrough
CT: control target
= control target key end

     0   :  { %s2691_s0 = inlined_call_operand.vmem [shape: f32[2,8,32], index: 0, kind: input, shape index: {}]   ;;  %s2692_s1 = inlined_call_operand.vmem [shape: f32[2,8,8], index: 1, kind: input, shape index: {}]   ;;  %s2693_s2 = inlined_call_operand.vmem [shape: f32[2,8,1], index: 2, kind: input, shape index: {}]   ;;  %s2694_s3 = inlined_call_operand.vmem [shape: bf16[32,96], index: 3, kind: input, shape index: {}]   ;;  %s2695_s4 = inlined_call_operand.hbm [shape: f32[1,96], index: 4, kind: input, shape index: {}]   ;;  %s2696_s5 = inlined_call_operand.vmem [shape: bf16[32,32], index: 5, kind: input, shape index: {}]   ;;  %s2697_s6 = inlined_call_operand.hbm [shape: f32[1,32], index: 6, kind: input, shape index: {}]   ;;  %s2698_s7 = inlined_call_operand.hbm [shape: f32[1,32], index: 7, kind: input, shape index: {}]   ;;  %s2699_s8 = inlined_call_operand.hbm [shape: f32[1,32], index: 8, kind: input, shape index: {}]   ;;  %s2700_s9 = inlined_call_operand.vmem [shape: bf16[32,64], index: 9, kind: input, shape index: {}]   ;;  %s2701_s10 = inlined_call_operand.vmem [shape: f32[1,64], index: 10, kind: input, shape index: {}]   ;;  %s2702_s11 = inlined_call_operand.vmem [shape: bf16[64,32], index: 11, kind: input, shape index: {}]   ;;  %s2703_s12 = inlined_call_operand.vmem [shape: f32[1,32], index: 12, kind: input, shape index: {}]   ;;  %s2704_s13 = inlined_call_operand.vmem [shape: f32[1,32], index: 13, kind: input, shape index: {}]   ;;  %s2705_s14 = inlined_call_operand.vmem [shape: f32[1,32], index: 14, kind: input, shape index: {}]   ;;  %s2706_s15 = inlined_call_operand.hbm [shape: f32[2,8,32], index: 15, kind: output, shape index: {0}]   ;;  %s2707_s16 = inlined_call_operand.hbm [shape: f32[4,2,8,8], index: 16, kind: output, shape index: {1}]  }
   0x1   :  { %2719 = sst [smem:[#allocation24_spill]] %s2691_s0 }
   0x2   :  { %2720 = sst [smem:[#allocation25_spill]] %s2692_s1 }
   0x3   :  { %2721 = sst [smem:[#allocation26_spill]] %s2704_s13 }
   0x4   :  { %2722 = sst [smem:[#allocation27_spill]] %s2705_s14 }
   0x5   :  { %2723 = sst [smem:[#allocation28_spill]] %s2706_s15 }
   0x6   :  { %22 = vsyncpa [#allocation3], 0 }
   0x7   :  { %23 = vsyncpa [#allocation6], 0 }
   0x8   :  { %24 = vsyncpa [#allocation9], 0 }
   0x9   :  { %25 = vsyncpa [#allocation4], 0 }
   0xa   :  { %27 = vsyncpa [#allocation4 + $0x1], 0 }
   0xb   :  { %28 = vsyncpa [#allocation12], 0 }
   0xc   :  { %30 = vsyncpa [#allocation12 + $0x1], 0  ;;  %s2269_s21 = smov 0   ;;  %s2271_s22 = smov 0  }
   0xd   :  { %s2273_s23 = smov 0   ;;  %s2275_s24 = smov 0  }
   0xe LB: > { %2724 = sst [smem:[#allocation18_spill]] %s2145_s21  ;;  %s2290_s25 = sadd.s32 4294967295, %s2157_s24   ;;  %s2157_s24 = sphi %s2275_s24, %s2754_s24   ;;  %s2153_s23 = sphi %s2273_s23, %s2756_s23   ;;  %s2149_s22 = sphi %s2271_s22, %s2758_s22   ;;  %s2145_s21 = sphi %s2269_s21, %s2757_s21  }
   0xf   : > { %2725 = sst [smem:[#allocation19_spill]] %s2153_s23  ;;  %s1634_s26 = sadd.s32 4294967294, %s2157_s24  }
  0x10   : > { %2726 = sst [smem:[#allocation20_spill]] %s2157_s24  ;;  %s2294_s27 = sadd.s32 1, %s2157_s24  }
  0x11   : > { %2727 = sst [smem:[#allocation21_spill]] %s2294_s27  ;;  %s373_s28 = sadd.s32 1, %s2153_s23 }
  0x12   : > { %s370_s29 = ssub.s32 %s2157_s24, %s2294_s27  ;;  %p383_p0 = scmp.ne.s32.totalorder %s2153_s23, %s2149_s22 }
  0x13   : > { %p371_p1 = scmp.eq.s32.totalorder %s370_s29, 0  ;;  %p384_p2 = scmp.eq.s32.totalorder %s2290_s25, 1 }
  0x14   : > { %p389_p3 = scmp.ne.s32.totalorder %s2149_s22, %s2145_s21  ;;  %p390_p4 = scmp.eq.s32.totalorder %s1634_s26, 1 }
  0x15   : > { %s2305_s30 = scalar_select %p371_p1, %s2153_s23, %s373_s28  }
  0x16   : > { %p2307_p5 = por %p384_p2, %p383_p0  ;;  %p2311_p6 = por %p390_p4, %p389_p3 }
  0x17   : > { %2728 = sst [smem:[#allocation22_spill]] %s2305_s30  ;;  %p1635_p7 = scmp.ge.s32.totalorder %s2157_s24, 1 }
  0x18   : > { %s2729_s0 = scalar_select %p2307_p5, 1, 0 }
  0x19   : > { %s2730_s17 = scalar_select %p2311_p6, 1, 0 }
  0x1a   : > { %p423_p8 = scmp.lt.s32.totalorder %s2157_s24, 3  ;;  %p2715_p9 = scmp.eq.s32.totalorder %s2290_s25, 0 }
  0x1b   : > { %2731 = sst [smem:[#allocation23_spill]] %s2730_s17  ;;  %s2159_s19 = smov [#allocation5]  }
  0x1c   : > { %p2318_p10 = pnand %p1635_p7, %p423_p8  ;;  %s453_s20 = sshll.u32 %s2159_s19, 4  ;;  %s454_s20 = int_to_ptr.vmem [resolvable:$true] %s453_s20 }
  0x1d   : > { %s2160_s26 = smov [#allocation2]   ;;  %s2161_s30 = smov [#allocation7]  }
  0x1e   : > { %s2732_s18 = scalar_select %p2318_p10, 1, 0 }
  0x1f   : > { %p1824_p11 = pneg %p2318_p10  ;;  %s439_s28 = sshll.u32 %s2160_s26, 4  ;;  %s2330_s28 = int_to_ptr.vmem [resolvable:$true] %s439_s28 }
  0x20   : > { %s464_s23 = sshll.u32 %s2161_s30, 4  ;;  %s1939_s19 = scalar_lea.hbm %s2697_s6, 16  ;;  %s2332_s23 = int_to_ptr.vmem [resolvable:$true] %s464_s23 }
  0x21   : > { %p2326_p12 = pnand %p2715_p9, %p1824_p11  ;;  %p1940_p13 = scmp.ne.s32.totalorder %s2697_s6, %s1939_s19 }
  0x22   : > { %p1946_p3 = scmp.lt.u32.totalorder %s1939_s19, %s2697_s6 }
  0x23   : > { %p2342_p0 = pneg %p2326_p12 }
  0x25   : > { %p1942_p1 = pnand %p2342_p0, %p1940_p13 }
  0x27   : > { %p1943_p2 = pneg %p1942_p1 }
  0x29   : > { %p1948_p4 = pnand %p1946_p3, %p1943_p2 }
  0x2b   : > { %1951 = shalt.err (!%p1948_p4)
}
  0x2c   : > { %s1952_s27 = scalar_lea.vmem %s454_s20, 16  ;;  %s1959_s21 = scalar_lea.vmem %s454_s20, 32 }
  0x2d   : > { %p1953_p7 = scmp.ne.s32.totalorder %s454_s20, %s1952_s27  ;;  %p1960_p9 = scmp.lt.s32.totalorder %s454_s20, %s454_s20 }
  0x2e   : > { %p1961_p6 = scmp.lt.s32.totalorder %s1959_s21, %s1952_s27 }
  0x2f   : > { %p1955_p8 = pnand %p1953_p7, %p2342_p0 }
  0x30   : > { %p1962_p5 = por %p1961_p6, %p1960_p9 }
  0x31   : > { %p1956_p11 = pneg %p1955_p8 }
  0x33   : > { %p1963_p10 = pnand %p1962_p5, %p1956_p11 }
  0x35   : > { %1966 = shalt.err (!%p1963_p10)
}
  0x36   : > { %1830 = dma.hbm_to_vmem [thread:$0]  (!%p2326_p12), %s2697_s6, 16, %s454_s20, [#allocation6]  }
  0x37   : > { %s1967_s30 = scalar_lea.hbm %s2695_s4, 16 }
  0x38   : > { %p1968_p13 = scmp.ne.s32.totalorder %s2695_s4, %s1967_s30  ;;  %p1974_p5 = scmp.lt.u32.totalorder %s1967_s30, %s2695_s4 }
  0x3a   : > { %p1970_p1 = pnand %p1968_p13, %p2342_p0 }
  0x3c   : > { %p1971_p6 = pneg %p1970_p1 }
  0x3e   : > { %p1976_p9 = pnand %p1974_p5, %p1971_p6 }
  0x40   : > { %1979 = shalt.err (!%p1976_p9)
}
  0x41   : > { %s1980_s20 = scalar_lea.vmem %s2330_s28, 16  ;;  %s1987_s13 = scalar_lea.vmem %s2330_s28, 32 }
  0x42   : > { %p1981_p10 = scmp.ne.s32.totalorder %s2330_s28, %s1980_s20  ;;  %p1988_p4 = scmp.lt.s32.totalorder %s2330_s28, %s2330_s28 }
  0x43   : > { %p1989_p7 = scmp.lt.s32.totalorder %s1987_s13, %s1980_s20 }
  0x44   : > { %p1983_p2 = pnand %p1981_p10, %p2342_p0 }
  0x45   : > { %p1990_p8 = por %p1989_p7, %p1988_p4 }
  0x46   : > { %p1984_p3 = pneg %p1983_p2 }
  0x48   : > { %p1991_p11 = pnand %p1990_p8, %p1984_p3 }
  0x4a   : > { %1994 = shalt.err (!%p1991_p11)
}
  0x4b   : > { %1827 = dma.hbm_to_vmem [thread:$0]  (!%p2326_p12), %s2695_s4, 16, %s2330_s28, [#allocation3]  }
  0x4c   : > { %s1995_s19 = scalar_lea.hbm %s2698_s7, 16 }
  0x4d   : > { %p1996_p13 = scmp.ne.s32.totalorder %s2698_s7, %s1995_s19  ;;  %p2002_p5 = scmp.lt.u32.totalorder %s1995_s19, %s2698_s7 }
  0x4f   : > { %p1998_p1 = pnand %p1996_p13, %p2342_p0 }
  0x51   : > { %p1999_p6 = pneg %p1998_p1 }
  0x53   : > { %p2004_p9 = pnand %p2002_p5, %p1999_p6 }
  0x55   : > { %2007 = shalt.err (!%p2004_p9)
}
  0x56   : > { %s2008_s28 = scalar_lea.vmem %s2332_s23, 16  ;;  %s2015_s13 = scalar_lea.vmem %s2332_s23, 32 }
  0x57   : > { %p2009_p10 = scmp.ne.s32.totalorder %s2332_s23, %s2008_s28  ;;  %p2016_p4 = scmp.lt.s32.totalorder %s2332_s23, %s2332_s23 }
  0x58   : > { %p2017_p7 = scmp.lt.s32.totalorder %s2015_s13, %s2008_s28 }
  0x59   : > { %p2011_p2 = pnand %p2009_p10, %p2342_p0 }
  0x5a   : > { %p2018_p8 = por %p2017_p7, %p2016_p4 }
  0x5b   : > { %p2012_p3 = pneg %p2011_p2 }
  0x5d   : > { %p2019_p11 = pnand %p2018_p8, %p2012_p3 }
  0x5f   : > { %2022 = shalt.err (!%p2019_p11)
}
  0x60   : > { %1833 = dma.hbm_to_vmem [thread:$0]  (!%p2326_p12), %s2698_s7, 16, %s2332_s23, [#allocation6]  }
  0x61   : > { %s2162_s17 = smov [#allocation8]   ;;  %s2023_s27 = scalar_lea.hbm %s2699_s8, 16 }
  0x62   : > { %s475_s15 = sshll.u32 %s2162_s17, 4  ;;  %p2024_p13 = scmp.ne.s32.totalorder %s2699_s8, %s2023_s27  ;;  %s476_s15 = int_to_ptr.vmem [resolvable:$true] %s475_s15 }
  0x63   : > { %p2030_p5 = scmp.lt.u32.totalorder %s2023_s27, %s2699_s8 }
  0x64   : > { %p2026_p1 = pnand %p2024_p13, %p2342_p0 }
  0x66   : > { %p2027_p6 = pneg %p2026_p1 }
  0x68   : > { %p2032_p9 = pnand %p2030_p5, %p2027_p6 }
  0x6a   : > { %2035 = shalt.err (!%p2032_p9)
}
  0x6b   : > { %s2036_s23 = scalar_lea.vmem %s476_s15, 16  ;;  %s2043_s14 = scalar_lea.vmem %s476_s15, 32 }
  0x6c   : > { %p2037_p10 = scmp.ne.s32.totalorder %s476_s15, %s2036_s23  ;;  %p2044_p4 = scmp.lt.s32.totalorder %s476_s15, %s476_s15 }
  0x6d   : > { %p2045_p7 = scmp.lt.s32.totalorder %s2043_s14, %s2036_s23 }
  0x6e   : > { %p2039_p2 = pnand %p2037_p10, %p2342_p0 }
  0x6f   : > { %p2046_p8 = por %p2045_p7, %p2044_p4 }
  0x70   : > { %p2040_p3 = pneg %p2039_p2 }
  0x72   : > { %p2047_p11 = pnand %p2046_p8, %p2040_p3 }
  0x74   : > { %2050 = shalt.err (!%p2047_p11)
}
  0x75   : > { %1836 = dma.hbm_to_vmem [thread:$0]  (!%p2326_p12), %s2699_s8, 16, %s476_s15, [#allocation9]  }
  0x76   : > { %p2735_p13 = scmp.ne.s32.totalorder %s2732_s18, 0 }
  0x77   : > { %p2736_p1 = scmp.eq.s32.totalorder (!%p2735_p13), %s2290_s25, 0 }
  0x78   : > { %527 = sbr.rel (%p2735_p13) target bundleno = 2702 (0xa8e), region = 80 }
  0x7f   : > { %2124 = dma.done.wait (%p2736_p1), [#allocation3], 16   ;;  %p2737_p0 = pmov %p2736_p1 }
  0x81   : > { %2126 = vsyncadd (%p2737_p0), [#allocation3], 4294967280  ;;  %p2738_p6 = pmov %p2737_p0 }
  0x82   : > { %p2739_p5 = pmov %p2737_p0 }
  0x83   : > { %2128 = dma.done.wait (%p2738_p6), [#allocation6], 32  }
  0x84   : > { %2130 = vsyncadd (%p2739_p5), [#allocation6], 4294967264  ;;  %p2740_p9 = pmov %p2737_p0 }
  0x85   : > { %p2741_p12 = pmov %p2737_p0 }
  0x86   : > { %2132 = dma.done.wait (%p2740_p9), [#allocation9], 16  }
  0x87   : > { %2134 = vsyncadd (%p2741_p12), [#allocation9], 4294967280  ;;  %p601_p10 = scmp.lt.s32.totalorder %s2290_s25, 1  ;;  %v2163_v0 = vmov 0.0   ;;  %vm2164_vm0 = vmmov 0   ;;  %s2742_s19 = sld [smem:[#allocation24_spill]] }
  0x88   : > { %1720 = vmatprep.subr.bf16.mxu0 %v2163_v0  ;;  %1724 = vmatprep.mubr.msk.bf16.mxu0 %vm2164_vm0, %v2163_v0  ;;  %v1909_v1 = vld [vmem:[%s2694_s3] sm:$0xff]   ;;  %v1910_v2 = vld [vmem:[%s2694_s3 + $0x8] sm:$0xff]   ;;  %vm643_vm1 = vcmask 261120   ;;  %s2165_s13 = smov 96   ;;  %s2166_s23 = smov 120   ;;  %vm693_vm2 = vcmask 64512  }
  0x89   : > { %s602_s18 = scalar_select %p601_p10, %s2290_s25, 1  ;;  %1728 = vmatprep.subr.bf16.mxu1 %v2163_v0  ;;  %1730 = vmatprep.mubr.msk.bf16.mxu1 %vm2164_vm0, %v2163_v0  ;;  %v1651_v5 = vld [vmem:[#allocation2] ss:$0 sm:$0xff]  ;;  %vm758_vm4 = vcmask 1043456   ;;  %vm1152_vm5 = vcmask 130048   ;;  %vm1154_vm6 = vcmask 195584  }
  0x8a   : > { %1721 = vmatpush3.bf16.msra.mxu0 %v1909_v1  ;;  %s2167_s14 = smov 88   ;;  %s2168_s24 = smov 80   ;;  %vm1368_vm7 = vcmask 523264  }
  0x8b   : > { %s2446_s29 = sshll.u32 %s602_s18, 3  ;;  %1722 = vmatprep.subr.bf16.mxu0 %v2163_v0  ;;  %s2169_s17 = smov 112  }
  0x8c   : > { %s2170_s18 = smov 72   ;;  %s2171_s26 = smov 104  }
  0x8d   : > { %s604_s30 = scalar_lea.vmem %s2742_s19, %s2446_s29  ;;  %s2743_s1 = sld [smem:[#allocation25_spill]] }
  0x8e   : > { %v2458_v3 = vld [vmem:[%s604_s30] sm:$0xff]  ;;  %1723 = vmatpush3.bf16.msra.mxu0 %v1910_v2  ;;  %s2172_s27 = smov 56   ;;  %s2173_s21 = smov 64  }
  0x8f   : > { %v619_v4 = vpack.c.bf16 %v2458_v3, %v2458_v3  ;;  %1734 = vmatprep.subr.bf16.mxu0 %v2163_v0  ;;  %s2174_s20 = smov 40   ;;  %s2175_s28 = smov 48  }
  0x90   : > { %s2177_s19 = smov 16   ;;  %p2744_p3 = scmp.ne.s32.totalorder %s2729_s0, 0 }
  0x91   : > { %1725 = vmatmul.mubr.msk.bf16.vlgmr.msra.gmra.mrb[0].mxu0 %vm643_vm1, %v619_v4 }
  0x92   : > { %1736 = vmatprep.mubr.msk.bf16.mxu0 %vm2164_vm0, %v2163_v0 }
  0x93   : > { %s608_s30 = scalar_lea.vmem %s2743_s1, %s2446_s29 }
  0x94   : > { %v616_v25 = vld [vmem:[%s608_s30] sm:$0xff]  ;;  %s2178_s30 = smov 24  }
  0x95   : > { %vm617_vm3 = vcmp.gt.f32.partialorder %v616_v25, 0.0 }
  0x96   : > { %v618_v26 = vsel %vm617_vm3, -1e+30, %v2163_v0 }
 0x164   : > { %v681_v6 = vpop.f32.mrb[0].mxu0 }
 0x165   : > { %v682_v7 = vadd.f32 %v1651_v5, %v681_v6  ;;  %v1726_v8 = vpop.f32.mrb[1].mxu0 }
 0x166   : > { %v684_v9 = vpop.f32.mrb[2].mxu0 }
 0x167   : > { %v687_v10 = vmul.f32 0.35355338, %v682_v7  ;;  %v2467_v11 = vpack.c.bf16 %v682_v7, %v682_v7  ;;  %v1727_v12 = vpop.f32.mrb[3].mxu0 }
 0x169   : > { %v688_v13 = vpack.c.bf16 %v687_v10, %v687_v10  ;;  %691 = vrot.lane.b32.xlu0 %v2467_v11, %s2165_s13  ;;  %s2511_s13 = sand.u32 1, %s2149_s22  }
 0x16b   : > { %803 = vrot.lane.b32.xlu1 %v688_v13, %s2166_s23  ;;  %s1647_s23 = sshll.u32 %s2511_s13, 5 }
 0x16d   : > { %805 = vrot.lane.b32.xlu0 %v2467_v11, %s2167_s14  ;;  %s2514_s14 = scalar_lea.vmem [#allocation11], %s1647_s23 }
 0x16f   : > { %917 = vrot.lane.b32.xlu1 %v2467_v11, %s2168_s24  ;;  %s2176_s24 = smov 8  }
 0x171   : > { %915 = vrot.lane.b32.xlu0 %v688_v13, %s2169_s17 }
 0x173   : > { %1029 = vrot.lane.b32.xlu1 %v2467_v11, %s2170_s18  ;;  %s2718_s18 = sshll.u32 %s2290_s25, 7 }
 0x175   : > { %1027 = vrot.lane.b32.xlu0 %v688_v13, %s2171_s26 }
 0x1db   : > { %v692_v14 = vpop.permute.xlu0 %691 }
 0x1dc   : > { %v698_v15 = vsel %vm693_vm2, %v692_v14, 0 }
 0x1dd   : > { %1729 = vmatpush3.bf16.xpose.msra.mxu1 %v698_v15  ;;  %v804_v17 = vpop.permute.xlu1 %803 }
 0x1de   : > { %1740 = vmatprep.subr.bf16.mxu1 %v2163_v0 }
 0x1df   : > { %v806_v16 = vpop.permute.xlu0 %805 }
 0x1e0   : > { %v811_v18 = vsel %vm693_vm2, %v806_v16, 0 }
 0x1e1   : > { %v918_v19 = vpop.permute.xlu1 %917 }
 0x1e2   : > { %v923_v20 = vsel %vm693_vm2, %v918_v19, 0 }
 0x1e3   : > { %v916_v22 = vpop.permute.xlu0 %915 }
 0x1e4   : > { %1731 = vmatmul.mubr.msk.bf16.vlgmr.msra.gmra.mrb[0].mxu1 %vm693_vm2, %v688_v13 }
 0x1e5   : > { %1741 = vmatpush3.bf16.xpose.msra.mxu1 %v811_v18  ;;  %1742 = vmatprep.mubr.msk.bf16.mxu1 %vm2164_vm0, %v2163_v0  ;;  %v1030_v21 = vpop.permute.xlu1 %1029 }
 0x1e6   : > { %1752 = vmatprep.subr.bf16.mxu1 %v2163_v0  ;;  %v1035_v23 = vsel %vm693_vm2, %v1030_v21, 0 }
 0x1e7   : > { %v1028_v24 = vpop.permute.xlu0 %1027 }
 0x1ec   : > { %1743 = vmatmul.mubr.msk.bf16.vlgmr.msra.gmra.mrb[4].mxu1 %vm693_vm2, %v804_v17 }
 0x1ed   : > { %1753 = vmatpush3.bf16.xpose.msra.mxu1 %v923_v20  ;;  %1754 = vmatprep.mubr.msk.bf16.mxu1 %vm2164_vm0, %v2163_v0 }
 0x1ee   : > { %1764 = vmatprep.subr.bf16.mxu1 %v2163_v0 }
 0x1f4   : > { %1755 = vmatmul.mubr.msk.bf16.vlgmr.msra.gmra.mrb[8].mxu1 %vm693_vm2, %v916_v22 }
 0x1f5   : > { %1765 = vmatpush3.bf16.xpose.msra.mxu1 %v1035_v23  ;;  %1766 = vmatprep.mubr.msk.bf16.mxu1 %vm2164_vm0, %v2163_v0 }
 0x1f6   : > { %1776 = vmatprep.subr.bf16.mxu1 %v2163_v0 }
 0x1fc   : > { %1767 = vmatmul.mubr.msk.bf16.vlgmr.msra.gmra.mrb[12].mxu1 %vm693_vm2, %v1028_v24 }
 0x1fd   : > { %1780 = vmatprep.mubr.msk.bf16.mxu1 %vm2164_vm0, %v2163_v0 }
 0x2b7   : > { %v734_v27 = vpop.f32.mrb[0].mxu1 }
 0x2b8   : > { %v735_v28 = vadd.f32 %v734_v27, %v618_v26  ;;  %v1732_v29 = vpop.f32.mrb[1].mxu1 }
 0x2b9   : > { %v737_v30 = vpop.f32.mrb[2].mxu1 }
 0x2ba   : > { %v1733_v31 = vpop.f32.mrb[3].mxu1  ;;  %v740_v32 = vsel %vm693_vm2, %v735_v28, -inf }
 0x2bb   : > { %741 = vmax.xlane.f32.xlu1 %v740_v32 }
 0x2bf   : > { %v847_v33 = vpop.f32.mrb[4].mxu1 }
 0x2c0   : > { %v848_v34 = vadd.f32 %v847_v33, %v618_v26  ;;  %v1744_v35 = vpop.f32.mrb[5].mxu1 }
 0x2c1   : > { %v850_v36 = vpop.f32.mrb[6].mxu1 }
 0x2c2   : > { %v1745_v37 = vpop.f32.mrb[7].mxu1  ;;  %v853_v38 = vsel %vm693_vm2, %v848_v34, -inf }
 0x2c3   : > { %854 = vmax.xlane.f32.xlu0 %v853_v38 }
 0x2c7   : > { %v959_v39 = vpop.f32.mrb[8].mxu1 }
 0x2c8   : > { %v960_v40 = vadd.f32 %v959_v39, %v618_v26  ;;  %v1756_v41 = vpop.f32.mrb[9].mxu1 }
 0x2c9   : > { %v962_v42 = vpop.f32.mrb[10].mxu1  ;;  %v1911_v41 = vld [vmem:[%s2696_s5] sm:$0xff]  }
 0x2ca   : > { %v1757_v43 = vpop.f32.mrb[11].mxu1  ;;  %v965_v44 = vsel %vm693_vm2, %v960_v40, -inf  ;;  %1777 = vmatpush3.bf16.msra.mxu1 %v1911_v41  ;;  %v1912_v42 = vld [vmem:[%s2696_s5 + $0x8] sm:$0xff]  }
 0x2cb   : > { %966 = vmax.xlane.f32.xlu0 %v965_v44  ;;  %1778 = vmatprep.subr.bf16.mxu1 %v2163_v0 }
 0x2ce   : > { %1779 = vmatpush3.bf16.msra.mxu1 %v1912_v42 }
 0x2cf   : > { %v1071_v45 = vpop.f32.mrb[12].mxu1  ;;  %1792 = vmatprep.subr.bf16.mxu1 %v2163_v0 }
 0x2d0   : > { %v1072_v46 = vadd.f32 %v1071_v45, %v618_v26  ;;  %v1768_v47 = vpop.f32.mrb[13].mxu1 }
 0x2d1   : > { %v1074_v48 = vpop.f32.mrb[14].mxu1 }
 0x2d2   : > { %v1769_v49 = vpop.f32.mrb[15].mxu1  ;;  %v1077_v50 = vsel %vm693_vm2, %v1072_v46, -inf }
 0x2d3   : > { %1078 = vmax.xlane.f32.xlu1 %v1077_v50 }
 0x348   : > { %v742_v51 = vpop.xlane.xlu1 %741 }
 0x349   : > { %v743_v52 = vsub.f32 %v735_v28, %v742_v51 }
 0x34b   : > { %v744_v53 = vmul.f32 1.442695, %v743_v52 }
 0x34d   : > { %1919 = vpow2.f32 %v744_v53 }
 0x350   : > { %v855_v54 = vpop.xlane.xlu0 %854 }
 0x351   : > { %v856_v55 = vsub.f32 %v848_v34, %v855_v54 }
 0x353   : > { %v857_v56 = vmul.f32 1.442695, %v856_v55 }
 0x355   : > { %1921 = vpow2.f32 %v857_v56 }
 0x357   : > { %v1920_v57 = vpop.eup %1919 }
 0x358   : > { %v967_v58 = vpop.xlane.xlu0 %966  ;;  %v746_v59 = vsel %vm693_vm2, %v1920_v57, 0.0 }
 0x359   : > { %v968_v60 = vsub.f32 %v960_v40, %v967_v58  ;;  %747 = vadd.xlane.f32.xlu0 %v746_v59  ;;  %v1666_v58 = vld [vmem:[#allocation5] ss:$0 sm:$0xff] }
 0x35b   : > { %v969_v61 = vmul.f32 1.442695, %v968_v60 }
 0x35d   : > { %1923 = vpow2.f32 %v969_v61 }
 0x35f   : > { %v1922_v62 = vpop.eup %1921 }
 0x360   : > { %v859_v63 = vsel %vm693_vm2, %v1922_v62, 0.0  ;;  %v1079_v4 = vpop.xlane.xlu1 %1078 }
 0x361   : > { %860 = vadd.xlane.f32.xlu1 %v859_v63  ;;  %v1080_v5 = vsub.f32 %v1072_v46, %v1079_v4  ;;  %v2179_v4 = vmov 0  }
 0x362   : > { %1908 = vset.pattern.permute.xlu0 %v2179_v4 }
 0x363   : > { %v1081_v6 = vmul.f32 1.442695, %v1080_v5 }
 0x365   : > { %1925 = vpow2.f32 %v1081_v6 }
 0x367   : > { %v1924_v1 = vpop.eup %1923 }
 0x368   : > { %v971_v2 = vsel %vm693_vm2, %v1924_v1, 0.0 }
 0x369   : > { %972 = vadd.xlane.f32.xlu0 %v971_v2 }
 0x36f   : > { %v1926_v7 = vpop.eup %1925 }
 0x370   : > { %v1083_v8 = vsel %vm693_vm2, %v1926_v7, 0.0 }
 0x372   : > { %867 = vrot.lane.b32.xlu1 %v2467_v11, %s2172_s27  ;;  %s1450_s27 = scalar_lea.sflag [#allocation12], %s2511_s13 }
 0x37f   : > { %753 = vrot.lane.b32.xlu0 %v2467_v11, %s2173_s21 }
 0x383   : > { %1091 = vrot.lane.b32.xlu0 %v2467_v11, %s2174_s20  ;;  %s612_s20 = scalar_lea.vmem %s2693_s2, %s2446_s29 }
 0x384   : > { %v615_v5 = vld [vmem:[%s612_s20] sm:$0xff]  ;;  %s2180_s20 = smov [#allocation11]  }
 0x396   : > { %1084 = vadd.xlane.f32.xlu1 %v1083_v8 }
 0x3a7   : > { %979 = vrot.lane.b32.xlu1 %v2467_v11, %s2175_s28  ;;  %s2055_s28 = sshll.u32 %s2180_s20, 4  ;;  %s2056_s28 = int_to_ptr.vmem [resolvable:$false] %s2055_s28 }
 0x3a8   : > { %s2057_s23 = scalar_lea.vmem %s2056_s28, 1024 }
 0x3e6   : > { %v748_v9 = vpop.xlane.xlu0 %747 }
 0x3e7   : > { %1927 = vrcp.f32 %v748_v9 }
 0x3ee   : > { %v861_v10 = vpop.xlane.xlu1 %860 }
 0x3ef   : > { %1929 = vrcp.f32 %v861_v10 }
 0x3f1   : > { %v1928_v12 = vpop.eup %1927 }
 0x3f2   : > { %v750_v13 = vmul.f32 %v1928_v12, %v1920_v57  ;;  %v868_v18 = vpop.permute.xlu1 %867  ;;  %v1914_v12 = vld [vmem:[%s2700_s9 + $0x8] sm:$0xff]  }
 0x3f3   : > { %v873_v20 = vsel %vm758_vm4, %v868_v18, 0  ;;  %v1670_v18 = vld [vmem:[#allocation7] ss:$0 sm:$0xff] }
 0x3f4   : > { %751 = vst.msk [vmem:[%s2514_s14] sm:$0xff] %vm693_vm2, %v750_v13  ;;  %v752_v19 = vpack.c.bf16 %v750_v13, %v750_v13  ;;  %v1915_v13 = vld [vmem:[%s2702_s11] sm:$0xff]  }
 0x3f6   : > { %v973_v14 = vpop.xlane.xlu0 %972 }
 0x3f7   : > { %1931 = vrcp.f32 %v973_v14  ;;  %v1916_v14 = vld [vmem:[%s2702_s11 + $0x8] sm:$0xff]  }
 0x3f9   : > { %v1930_v15 = vpop.eup %1929 }
 0x3fa   : > { %v863_v11 = vmul.f32 %v1930_v15, %v1922_v62  ;;  %v754_v16 = vpop.permute.xlu0 %753 }
 0x3fb   : > { %v760_v17 = vsel %vm758_vm4, %v754_v16, 0 }
 0x3fc   : > { %1735 = vmatpush3.bf16.msra.mxu0 %v760_v17  ;;  %1658 = vst.msk [vmem:[%s2514_s14 + $0x8] sm:$0xff] %vm693_vm2, %v863_v11  ;;  %v866_v23 = vpack.c.bf16 %v863_v11, %v863_v11 }
 0x3fd   : > { %1746 = vmatprep.subr.bf16.mxu0 %v2163_v0 }
 0x3fe   : > { %v1092_v27 = vpop.permute.xlu0 %1091 }
 0x3ff   : > { %1737 = vmatmul.mubr.msk.bf16.vlgmr.msra.gmra.mrb[4].mxu0 %vm693_vm2, %v752_v19  ;;  %v1097_v29 = vsel %vm758_vm4, %v1092_v27, 0  ;;  %v1918_v27 = vld [vmem:[%s2702_s11 + $0x18] sm:$0xff]  }
 0x400   : > { %1747 = vmatpush3.bf16.msra.mxu0 %v873_v20  ;;  %1748 = vmatprep.mubr.msk.bf16.mxu0 %vm2164_vm0, %v2163_v0  ;;  %v1671_v20 = vld [vmem:[#allocation8] ss:$0 sm:$0xff] }
 0x401   : > { %v1932_v21 = vpop.eup %1931  ;;  %1758 = vmatprep.subr.bf16.mxu0 %v2163_v0 }
 0x402   : > { %v975_v22 = vmul.f32 %v1932_v21, %v1924_v1 }
 0x404   : > { %1661 = vst.msk [vmem:[%s2514_s14 + $0x10] sm:$0xff] %vm693_vm2, %v975_v22  ;;  %v978_v28 = vpack.c.bf16 %v975_v22, %v975_v22 }
 0x407   : > { %1749 = vmatmul.mubr.msk.bf16.vlgmr.msra.gmra.mrb[8].mxu0 %vm693_vm2, %v866_v23 }
 0x408   : > { %1760 = vmatprep.mubr.msk.bf16.mxu0 %vm2164_vm0, %v2163_v0 }
 0x423   : > { %v1085_v24 = vpop.xlane.xlu1 %1084 }
 0x424   : > { %1933 = vrcp.f32 %v1085_v24 }
 0x427   : > { %v980_v25 = vpop.permute.xlu1 %979 }
 0x428   : > { %v985_v26 = vsel %vm758_vm4, %v980_v25, 0 }
 0x429   : > { %1759 = vmatpush3.bf16.msra.mxu0 %v985_v26  ;;  %v1917_v26 = vld [vmem:[%s2702_s11 + $0x10] sm:$0xff]  }
 0x42a   : > { %1770 = vmatprep.subr.bf16.mxu0 %v2163_v0 }
 0x42c   : > { %1761 = vmatmul.mubr.msk.bf16.vlgmr.msra.gmra.mrb[12].mxu0 %vm693_vm2, %v978_v28  ;;  %v1672_v28 = vld [vmem:[%s2701_s10] ss:$0 sm:$0xff] }
 0x42d   : > { %1771 = vmatpush3.bf16.msra.mxu0 %v1097_v29  ;;  %1772 = vmatprep.mubr.msk.bf16.mxu0 %vm2164_vm0, %v2163_v0 }
 0x42e   : > { %v1934_v30 = vpop.eup %1933  ;;  %1784 = vmatprep.subr.bf16.mxu0 %v2163_v0 }
 0x42f   : > { %v1087_v31 = vmul.f32 %v1934_v30, %v1926_v7 }
 0x431   : > { %v1090_v32 = vpack.c.bf16 %v1087_v31, %v1087_v31  ;;  %1664 = vst.msk [vmem:[%s2514_s14 + $0x18] sm:$0xff] %vm693_vm2, %v1087_v31 }
 0x434   : > { %1773 = vmatmul.mubr.msk.bf16.vlgmr.msra.gmra.mrb[16].mxu0 %vm693_vm2, %v1090_v32 }
 0x435   : > { %1788 = vmatprep.mubr.msk.bf16.mxu0 %vm2164_vm0, %v2163_v0 }
 0x4d2   : > { %v796_v33 = vpop.f32.mrb[4].mxu0 }
 0x4d3   : > { %v1738_v34 = vpop.f32.mrb[5].mxu0 }
 0x4d4   : > { %v799_v35 = vpop.f32.mrb[6].mxu0 }
 0x4d5   : > { %v1739_v36 = vpop.f32.mrb[7].mxu0 }
 0x4da   : > { %v909_v37 = vpop.f32.mrb[8].mxu0 }
 0x4db   : > { %1140 = vrot.lane.b32.xlu1 %v909_v37, %s2176_s24  ;;  %v1750_v38 = vpop.f32.mrb[9].mxu0 }
 0x4dc   : > { %v912_v39 = vpop.f32.mrb[10].mxu0 }
 0x4dd   : > { %v1751_v40 = vpop.f32.mrb[11].mxu0 }
 0x4ff   : > { %v1021_v43 = vpop.f32.mrb[12].mxu0 }
 0x500   : > { %1144 = vrot.lane.b32.xlu0 %v1021_v43, %s2177_s19  ;;  %v1762_v44 = vpop.f32.mrb[13].mxu0  ;;  %s2604_s19 = scalar_lea.hbm %s2707_s16, %s2718_s18 }
 0x501   : > { %v1024_v45 = vpop.f32.mrb[14].mxu0 }
 0x502   : > { %v1763_v46 = vpop.f32.mrb[15].mxu0 }
 0x507   : > { %v1133_v47 = vpop.f32.mrb[16].mxu0 }
 0x508   : > { %1148 = vrot.lane.b32.xlu1 %v1133_v47, %s2178_s30  ;;  %v1774_v48 = vpop.f32.mrb[17].mxu0  ;;  %s1475_s30 = sshll.u32 %s2514_s14, 4  ;;  %s2607_s30 = int_to_ptr.vmem [resolvable:$true] %s1475_s30 }
 0x509   : > { %v1136_v49 = vpop.f32.mrb[18].mxu0  ;;  %s2051_s21 = scalar_lea.vmem %s2607_s30, 512  ;;  %p2058_p8 = scmp.lt.s32.totalorder %s2607_s30, %s2056_s28 }
 0x50a   : > { %v1775_v50 = vpop.f32.mrb[19].mxu0  ;;  %p2052_p2 = scmp.ne.s32.totalorder %s2607_s30, %s2051_s21  ;;  %p2059_p11 = scmp.lt.s32.totalorder %s2057_s23, %s2051_s21 }
 0x50c   : > { %p2053_p4 = pnand %p2052_p2, %p2744_p3  ;;  %p2060_p13 = por %p2059_p11, %p2058_p8 }
 0x50e   : > { %p2054_p7 = pneg %p2053_p4 }
 0x510   : > { %p2061_p1 = pnand %p2060_p13, %p2054_p7 }
 0x54d   : > { %v1141_v51 = vpop.permute.xlu1 %1140 }
 0x54e   : > { %v1151_v53 = vsel %vm693_vm2, %v796_v33, %v1141_v51 }
 0x572   : > { %v1145_v52 = vpop.permute.xlu0 %1144 }
 0x573   : > { %v1153_v54 = vsel %vm1152_vm5, %v1151_v53, %v1145_v52 }
 0x57a   : > { %v1149_v55 = vpop.permute.xlu1 %1148 }
 0x57b   : > { %v1155_v56 = vsel %vm1154_vm6, %v1153_v54, %v1149_v55 }
 0x57c   : > { %v1156_v57 = vpack.c.bf16 %v1155_v56, %v1155_v56 }
 0x57e   : > { %1781 = vmatmul.mubr.msk.bf16.vlgmr.msra.gmra.mrb[16].mxu1 %vm643_vm1, %v1156_v57 }
 0x57f   : > { %1800 = vmatprep.mubr.msk.bf16.mxu1 %vm2164_vm0, %v2163_v0  ;;  %1793 = vmatpush3.bf16.msra.mxu1 %v1915_v13 }
 0x580   : > { %1794 = vmatprep.subr.bf16.mxu1 %v2163_v0 }
 0x583   : > { %1795 = vmatpush3.bf16.msra.mxu1 %v1916_v14 }
 0x584   : > { %1796 = vmatprep.subr.bf16.mxu1 %v2163_v0 }
 0x587   : > { %1797 = vmatpush3.bf16.msra.mxu1 %v1917_v26 }
 0x588   : > { %1798 = vmatprep.subr.bf16.mxu1 %v2163_v0 }
 0x58b   : > { %1799 = vmatpush3.bf16.msra.mxu1 %v1918_v27 }
 0x651   : > { %v1217_v59 = vpop.f32.mrb[16].mxu1 }
 0x652   : > { %v1218_v60 = vadd.f32 %v1666_v58, %v1217_v59  ;;  %v1782_v61 = vpop.f32.mrb[17].mxu1 }
 0x653   : > { %v1220_v62 = vpop.f32.mrb[18].mxu1 }
 0x654   : > { %v1783_v63 = vpop.f32.mrb[19].mxu1  ;;  %v1223_v1 = vadd.f32 %v1218_v60, %v2458_v3  ;;  %v1913_v3 = vld [vmem:[%s2700_s9] sm:$0xff]  }
 0x655   : > { %1785 = vmatpush3.bf16.msra.mxu0 %v1913_v3 }
 0x656   : > { %v1226_v2 = vsel %vm643_vm1, %v1223_v1, 0.0  ;;  %1786 = vmatprep.subr.bf16.mxu0 %v2163_v0  ;;  %v1676_v0 = vld [vmem:[%s2703_s12] ss:$0 sm:$0xff] }
 0x657   : > { %1227 = vadd.xlane.f32.xlu0 %v1226_v2 }
 0x659   : > { %1787 = vmatpush3.bf16.msra.mxu0 %v1914_v12 }
 0x66d   : > { %1256 = vperm.xlu0 %1908, %v615_v5  }
 0x6e4   : > { %v1228_v6 = vpop.xlane.xlu0 %1227 }
 0x6e5   : > { %v1230_v7 = vmul.f32 0.03125, %v1228_v6 }
 0x6e7   : > { %v1231_v8 = vsub.f32 %v1223_v1, %v1230_v7 }
 0x6e9   : > { %v1232_v9 = vmul.f32 %v1231_v8, %v1231_v8 }
 0x6eb   : > { %v1233_v10 = vsel %vm643_vm1, %v1232_v9, 0.0 }
 0x6ec   : > { %1234 = vadd.xlane.f32.xlu1 %v1233_v10  ;;  %v2579_v22 = vpop.permute.xlu0 %1256 }
 0x779   : > { %v1235_v15 = vpop.xlane.xlu1 %1234 }
 0x77a   : > { %v1236_v11 = vmul.f32 0.03125, %v1235_v15 }
 0x77c   : > { %v1237_v16 = vadd.f32 1e-05, %v1236_v11 }
 0x77e   : > { %1935 = vrsqrt.f32 %v1237_v16 }
 0x788   : > { %v1936_v17 = vpop.eup %1935 }
 0x789   : > { %v1239_v19 = vmul.f32 %v1936_v17, %v1231_v8 }
 0x78b   : > { %v1246_v21 = vmul.f32 %v1670_v18, %v1239_v19 }
 0x78d   : > { %v1253_v23 = vadd.f32 %v1671_v20, %v1246_v21 }
 0x78f   : > { %v1259_v24 = vmul.f32 %v2579_v22, %v1253_v23 }
 0x791   : > { %v1260_v25 = vpack.c.bf16 %v1259_v24, %v1259_v24 }
 0x793   : > { %1789 = vmatmul.mubr.msk.bf16.vlgmr.msra.gmra.mrb[20].mxu0 %vm643_vm1, %v1260_v25 }
 0x866   : > { %v1321_v29 = vpop.f32.mrb[20].mxu0 }
 0x867   : > { %v1322_v30 = vadd.f32 %v1672_v28, %v1321_v29  ;;  %v1790_v31 = vpop.f32.mrb[21].mxu0 }
 0x868   : > { %v1324_v32 = vpop.f32.mrb[22].mxu0 }
 0x869   : > { %v1327_v33 = vmax.f32 %v1322_v30, 0.0  ;;  %v1791_v34 = vpop.f32.mrb[23].mxu0 }
 0x86b   : > { %v1328_v35 = vpack.c.bf16 %v1327_v33, %v1327_v33 }
 0x86d   : > { %1801 = vmatmul.mubr.msk.bf16.vlgmr.msra.gmra.mrb[20].mxu1 %vm1368_vm7, %v1328_v35 }
 0x940   : > { %v1406_v36 = vpop.f32.mrb[20].mxu1 }
 0x941   : > { %v1407_v37 = vadd.f32 %v1676_v0, %v1406_v36  ;;  %v1802_v38 = vpop.f32.mrb[21].mxu1 }
 0x942   : > { %v1409_v39 = vpop.f32.mrb[22].mxu1 }
 0x943   : > { %v1803_v40 = vpop.f32.mrb[23].mxu1  ;;  %v1412_v41 = vadd.f32 %v1407_v37, %v1259_v24 }
 0x945   : > { %v1415_v42 = vsel %vm643_vm1, %v1412_v41, 0.0 }
 0x946   : > { %1416 = vadd.xlane.f32.xlu1 %v1415_v42 }
 0x9d3   : > { %v1417_v43 = vpop.xlane.xlu1 %1416 }
 0x9d4   : > { %v1418_v44 = vmul.f32 0.03125, %v1417_v43 }
 0x9d6   : > { %v1419_v45 = vsub.f32 %v1412_v41, %v1418_v44 }
 0x9d8   : > { %v1420_v46 = vmul.f32 %v1419_v45, %v1419_v45 }
 0x9da   : > { %v1421_v47 = vsel %vm643_vm1, %v1420_v46, 0.0 }
 0x9db   : > { %1422 = vadd.xlane.f32.xlu1 %v1421_v47 }
 0x9dc   : > { %2064 = shalt.err (!%p2061_p1)
}
 0x9dd   : > { %s2065_s14 = scalar_lea.hbm %s2604_s19, 512  ;;  %s2069_s26 = scalar_lea.hbm %s2707_s16, 1024 }
 0x9de   : > { %p2066_p0 = scmp.ne.s32.totalorder %s2604_s19, %s2065_s14  ;;  %p2070_p9 = scmp.lt.u32.totalorder %s2604_s19, %s2707_s16 }
 0x9df   : > { %p2071_p12 = scmp.lt.u32.totalorder %s2069_s26, %s2065_s14  ;;  %p2073_p2 = scmp.lt.u32.totalorder %s2065_s14, %s2604_s19 }
 0x9e0   : > { %p2067_p6 = pnand %p2066_p0, %p2744_p3 }
 0x9e1   : > { %p2072_p10 = por %p2071_p12, %p2070_p9 }
 0x9e2   : > { %p2068_p5 = pneg %p2067_p6 }
 0x9e3   : > { %p2074_p4 = por %p2073_p2, %p2072_p10 }
 0x9e5   : > { %p2075_p7 = pnand %p2074_p4, %p2068_p5 }
 0x9e7   : > { %2078 = shalt.err (!%p2075_p7)
}
 0x9e8   : > { %s2181_s21 = smov 128   ;;  %s2182_s28 = smov 256  }
 0x9e9   : > { %1821 = dma.vmem_to_hbm [thread:$0]  (%p2744_p3), %s2607_s30, 512, %s2604_s19, %s1450_s27, %s2181_s21, %s2182_s28, %s2176_s24  }
 0x9ea   : > { %s1646_s23 = sshll.u32 %s2511_s13, 3  ;;  %s2745_s29 = sld [smem:[#allocation26_spill]] }
 0x9eb   : > { %s2746_s20 = sld [smem:[#allocation27_spill]]  ;;  %s593_s18 = scalar_lea.vmem [#allocation10], %s1646_s23 }
 0x9ec   : > { %s1463_s24 = sshll.u32 %s593_s18, 4  ;;  %s2747_s19 = sshll.u32 %s2290_s25, 7  ;;  %s2649_s24 = int_to_ptr.vmem [resolvable:$true] %s1463_s24 }
 0x9ed   : > { %s2748_s21 = sld [smem:[#allocation28_spill]]  ;;  %s1445_s14 = scalar_lea.sflag [#allocation4], %s2511_s13 }
 0x9ee   : > { %s2079_s17 = scalar_lea.vmem %s2649_s24, 128  ;;  %s2183_s23 = smov [#allocation10]  }
 0x9ef   : > { %p2080_p8 = scmp.ne.s32.totalorder %s2649_s24, %s2079_s17  ;;  %s2083_s25 = sshll.u32 %s2183_s23, 4  ;;  %s2084_s25 = int_to_ptr.vmem [resolvable:$false] %s2083_s25 }
 0x9f0   : > { %v1682_v52 = vld [vmem:[%s2745_s29] ss:$0 sm:$0xff]  ;;  %s2085_s29 = scalar_lea.vmem %s2084_s25, 256  ;;  %p2086_p1 = scmp.lt.s32.totalorder %s2649_s24, %s2084_s25 }
 0x9f1   : > { %v1683_v54 = vld [vmem:[%s2746_s20] ss:$0 sm:$0xff]  ;;  %p2081_p11 = pnand %p2080_p8, %p2744_p3  ;;  %p2087_p0 = scmp.lt.s32.totalorder %s2085_s29, %s2079_s17 }
 0x9f3   : > { %s2749_s28 = smov %s2748_s21  ;;  %s2647_s1 = scalar_lea.hbm %s2748_s21, %s2747_s19 }
 0x9f4   : > { %p2082_p13 = pneg %p2081_p11  ;;  %p2088_p6 = por %p2087_p0, %p2086_p1 }
 0x9f6   : > { %p2089_p5 = pnand %p2088_p6, %p2082_p13 }
 0xa68   : > { %v1423_v48 = vpop.xlane.xlu1 %1422 }
 0xa69   : > { %v1424_v49 = vmul.f32 0.03125, %v1423_v48 }
 0xa6b   : > { %v1425_v50 = vadd.f32 1e-05, %v1424_v49 }
 0xa6d   : > { %1937 = vrsqrt.f32 %v1425_v50 }
 0xa77   : > { %v1938_v51 = vpop.eup %1937 }
 0xa78   : > { %v1427_v53 = vmul.f32 %v1938_v51, %v1419_v45 }
 0xa7a   : > { %v1434_v55 = vmul.f32 %v1682_v52, %v1427_v53 }
 0xa7c   : > { %v1441_v56 = vadd.f32 %v1683_v54, %v1434_v55 }
 0xa7e   : > { %v1442_v57 = vmul.f32 %v1441_v56, %v2579_v22 }
 0xa80   : > { %1443 = vst.msk [vmem:[%s593_s18] sm:$0xff] %vm643_vm1, %v1442_v57 }
 0xa81   : > { %2092 = shalt.err (!%p2089_p5)
}
 0xa82   : > { %s2093_s13 = scalar_lea.hbm %s2647_s1, 128  ;;  %s2097_s15 = scalar_lea.hbm %s2749_s28, 256 }
 0xa83   : > { %p2094_p9 = scmp.ne.s32.totalorder %s2647_s1, %s2093_s13  ;;  %p2098_p2 = scmp.lt.u32.totalorder %s2647_s1, %s2749_s28 }
 0xa84   : > { %p2099_p4 = scmp.lt.u32.totalorder %s2097_s15, %s2093_s13  ;;  %p2101_p8 = scmp.lt.u32.totalorder %s2093_s13, %s2647_s1 }
 0xa85   : > { %p2095_p12 = pnand %p2094_p9, %p2744_p3 }
 0xa86   : > { %p2100_p7 = por %p2099_p4, %p2098_p2 }
 0xa87   : > { %p2096_p10 = pneg %p2095_p12 }
 0xa88   : > { %p2102_p11 = por %p2101_p8, %p2100_p7 }
 0xa8a   : > { %p2103_p13 = pnand %p2102_p11, %p2096_p10 }
 0xa8c   : > { %2106 = shalt.err (!%p2103_p13)
}
 0xa8d   : > { %1820 = dma.vmem_to_hbm [thread:$0]  (%p2744_p3), %s2649_s24, 128, %s2647_s1, %s1445_s14  }
 0xa8e PF: > { %s2750_s30 = sld [smem:[#allocation20_spill]]  ;;  %s2751_s27 = sld [smem:[#allocation18_spill]] }
 0xa8f   : > { %s2752_s21 = sld [smem:[#allocation23_spill]] }
 0xa94   : > { %p1852_p1 = scmp.ge.s32.totalorder %s2750_s30, 2  ;;  %s1490_s17 = sand.u32 1, %s2751_s27  }
 0xa95   : > { %p2753_p0 = scmp.ne.s32.totalorder %s2752_s21, 0  ;;  %s1491_s23 = scalar_lea.sflag [#allocation4], %s1490_s17 }
 0xa97   : > { %p1838_p6 = pnand %p1852_p1, %p2753_p0 }
 0xa99   : > { %2136 = dma.done.wait (!%p1838_p6), %s1491_s23, 128  }
 0xa9a   : > { %2138 = vsyncadd (!%p1838_p6), %s1491_s23, 4294967168  ;;  %s1500_s25 = scalar_lea.sflag [#allocation12], %s1490_s17 }
 0xa9b   : > { %2140 = dma.done.wait (!%p1838_p6), %s1500_s25, 512  }
 0xa9c   : > { %2142 = vsyncadd (!%p1838_p6), %s1500_s25, 4294966784  ;;  %s2754_s24 = sld [smem:[#allocation21_spill]]  ;;  %s2755_s0 = sld [smem:[#allocation19_spill]] }
 0xa9d   : > { %s2756_s23 = sld [smem:[#allocation22_spill]]  ;;  %s2757_s21 = smov %s2149_s22 }
 0xaa2   : > { %p33_p3 = scmp.ge.s32.totalorder %s2754_s24, 4   ;;  %s2758_s22 = smov %s2755_s0 }
 0xaa4   :  { %35 = sbr.rel (!%p33_p3) target bundleno = 14 (0xe), region = 158 }
 0xaab   :  { %1505 = vsyncpa [#allocation3], 1 }
 0xaac   :  { %1507 = vsyncpa [#allocation3 + $0x1], 1 }
 0xaad   :  { %1508 = vsyncpa [#allocation6], 1 }
 0xaae   :  { %1509 = vsyncpa [#allocation9], 1 }
 0xaaf   :  { %1510 = vsyncpa [#allocation4], 1 }
 0xab0   :  { %1512 = vsyncpa [#allocation4 + $0x1], 1 }
 0xab1   :  { %1513 = vsyncpa [#allocation12], 1 }
 0xab2   :  { %1515 = vsyncpa [#allocation12 + $0x1], 1 }

</bundles_post_ra>
